<compile_context>
chip_gen: v7x
topology: tpu7x:2x2x1
jax: 0.10.0
libtpu: 0.0.40
codegen_flags: <defaults>
</compile_context>

<pallas_src>
import jax
import jax.numpy as jnp
from jax.experimental import pallas as pl
from jax.experimental.pallas import tpu as pltpu

_LEAKY_SLOPE = 0.01   # nn.LeakyReLU default negative_slope
_BN_EPS = 1e-5        # nn.BatchNorm2d default eps
_VMEM_LIMIT = 32 * 1024 * 1024     # safe on v5e / v6e / v7x
_VMEM_BUDGET = 6 * 1024 * 1024     # per-step block budget used by the tile chooser


# ---------------- in-kernel helpers (traced inside kernels) ----------------

def _conv3x3_from_pad(pad_ref, w_ref, th, w2, cout):
    """'same' 3x3 conv read from a zero-padded (th+2, w2+2, Cin) bf16 VMEM scratch.

    Nine shifted (pixels, Cin) @ (Cin, Cout) bf16 MXU matmuls, f32 accumulation.
    w_ref[kh*3 + kw] holds the (Cin, Cout) tap matrix (== torch_w[:, :, kh, kw].T).
    No bias: a pre-BatchNorm per-channel constant cancels exactly.
    """
    cin = pad_ref.shape[-1]
    acc = jnp.zeros((th * w2, cout), jnp.float32)
    for k in range(9):
        kh, kw = divmod(k, 3)
        win = pad_ref[pl.ds(kh, th), pl.ds(kw, w2), :].reshape(th * w2, cin)
        acc = acc + jnp.dot(win, w_ref[k], preferred_element_type=jnp.float32)
    return acc


def _partial_stats(acc):
    """Per-channel [sum, sum_sq] of a (pixels, C) f32 slab -> (2, C)."""
    return jnp.concatenate(
        [jnp.sum(acc, axis=0, keepdims=True),
         jnp.sum(acc * acc, axis=0, keepdims=True)], axis=0)


# ---------------- Pallas kernels ----------------

def _pool_conv1_kernel(xm_ref, xt_ref, xb_ref, w_ref, y_ref, s_ref, pad_ref):
    # xm_ref: (1, TH, 2, W2, 2*Cin) main row-tile (pool window exposed statically)
    # xt_ref/xb_ref: (1, 1, 2, W2, 2*Cin) one-row halos (clamped row index)
    # w_ref: (9, Cin, Cm) bf16 taps
    # y_ref: (1, TH, W2, Cm) bf16 conv1 output (pre-BN)
    # s_ref: (1, 1, 2, Cm) f32 BN1 partials; pad_ref: (TH+2, W2+2, Cin) bf16 scratch
    _, th, w2, cm = y_ref.shape
    cin = pad_ref.shape[-1]
    r = pl.program_id(1)
    nr = pl.num_programs(1)

    # 2x2 max-pool in f32 on the VPU; only the MXU operand below is bf16.
    rows = jnp.maximum(xm_ref[0, :, 0, :, :], xm_ref[0, :, 1, :, :])      # (TH, W2, 2Cin)
    pooled = jnp.maximum(rows[..., :cin], rows[..., cin:])                # (TH, W2, Cin)
    rows_t = jnp.maximum(xt_ref[0, 0, 0, :, :], xt_ref[0, 0, 1, :, :])    # (W2, 2Cin)
    pooled_t = jnp.maximum(rows_t[..., :cin], rows_t[..., cin:])
    rows_b = jnp.maximum(xb_ref[0, 0, 0, :, :], xb_ref[0, 0, 1, :, :])
    pooled_b = jnp.maximum(rows_b[..., :cin], rows_b[..., cin:])

    # Zero-padded scratch: zero once, then write interior + (masked) halo rows.
    pad_ref[...] = jnp.zeros(pad_ref.shape, pad_ref.dtype)
    pad_ref[pl.ds(1, th), pl.ds(1, w2), :] = pooled.astype(pad_ref.dtype)
    top = jnp.where(r > 0, pooled_t, 0.0).astype(pad_ref.dtype)           # zero at border
    pad_ref[pl.ds(0, 1), pl.ds(1, w2), :] = top[None]
    bot = jnp.where(r < nr - 1, pooled_b, 0.0).astype(pad_ref.dtype)
    pad_ref[pl.ds(th + 1, 1), pl.ds(1, w2), :] = bot[None]

    acc = _conv3x3_from_pad(pad_ref, w_ref, th, w2, cm)                   # (TH*W2, Cm) f32
    y_ref[0] = acc.reshape(th, w2, cm).astype(y_ref.dtype)
    s_ref[...] = _partial_stats(acc)[None, None]


def _bn1_lrelu_conv2_kernel(ym_ref, yt_ref, yb_ref, sc_ref, sh_ref, w_ref,
                            y2_ref, s_ref, pad_ref):
    # ym_ref: (1, TH, W2, Cm) conv1 output (pre-BN, bf16); yt/yb: 1-row halos.
    # sc/sh: (1, Cm) f32 folded BN1 scale/shift (batch statistics).
    # w_ref: (9, Cm, Cm) bf16; y2_ref: (1, TH, W2, Cm) bf16; s_ref: (1, 1, 2, Cm) f32.
    _, th, w2, cm = y2_ref.shape
    r = pl.program_id(1)
    nr = pl.num_programs(1)
    sc = sc_ref[...]
    sh = sh_ref[...]

    def bn_act(v):                                       # BN affine + LeakyReLU (f32)
        t = v.astype(jnp.float32) * sc + sh
        return jnp.where(t > 0, t, _LEAKY_SLOPE * t)

    main = bn_act(ym_ref[0])                             # (TH, W2, Cm)
    top = jnp.where(r > 0, bn_act(yt_ref[0, 0]), 0.0)    # (W2, Cm), zero at border
    bot = jnp.where(r < nr - 1, bn_act(yb_ref[0, 0]), 0.0)
    # TODO(synk): nn.Dropout with p > 0 (training-mode stochastic mask) would go
    # here via pltpu.prng_seed / pltpu.prng_random_bits; the demo uses p = 0.0.

    pad_ref[...] = jnp.zeros(pad_ref.shape, pad_ref.dtype)
    pad_ref[pl.ds(1, th), pl.ds(1, w2), :] = main.astype(pad_ref.dtype)
    pad_ref[pl.ds(0, 1), pl.ds(1, w2), :] = top.astype(pad_ref.dtype)[None]
    pad_ref[pl.ds(th + 1, 1), pl.ds(1, w2), :] = bot.astype(pad_ref.dtype)[None]

    acc = _conv3x3_from_pad(pad_ref, w_ref, th, w2, cm)
    y2_ref[0] = acc.reshape(th, w2, cm).astype(y2_ref.dtype)
    s_ref[...] = _partial_stats(acc)[None, None]


# ---------------- wrapper ----------------

def _fold_bn(stats, count, gamma, beta, eps):
    """Fold per-tile [sum, sum_sq] partials + gamma/beta into (1, C) f32 scale/shift.

    Biased batch variance (PyTorch training-mode forward normalization)."""
    ssum = jnp.sum(stats[..., 0, :], axis=(0, 1))
    ssq = jnp.sum(stats[..., 1, :], axis=(0, 1))
    mean = ssum / count
    var = jnp.maximum(ssq / count - mean * mean, 0.0)
    scale = (gamma * jax.lax.rsqrt(var + eps)).astype(jnp.float32)
    shift = (beta - mean * scale).astype(jnp.float32)
    return scale.reshape(1, -1), shift.reshape(1, -1)


def _pick_row_tile(h2, w2, cin, cm, budget_bytes=_VMEM_BUDGET):
    """Largest divisor of H2 whose per-step blocks fit the VMEM budget."""
    fixed = 9 * cin * cm * 2 + 9 * cm * cm * 2 + 8 * cm * 4 + 64 * 1024
    per_row = 2 * (2 * w2 * 2 * cin * 4)          # K1 input block (f32, double-buffered)
    per_row += 2 * (w2 * cm * 2) * 2              # y1 write + y1 read (bf16, x2 buffers)
    per_row += 2 * (w2 * cm * 2)                  # y2 write (bf16, x2 buffers)
    per_row += 2 * (w2 + 2) * max(cin, cm) * 2    # padded scratches (bf16)
    per_row += 2 * (w2 * cm * 4)                  # f32 accumulators (live values)
    for th in range(h2, 0, -1):
        if h2 % th == 0 and fixed + th * per_row <= budget_bytes:
            return th
    return 1


def down_block_nhwc(x, params, *, eps=_BN_EPS, row_tile=None):
    """DownBlock forward, NHWC in / NHWC out (training-mode BN stats, dropout p=0)."""
    n, h, w, cin = x.shape
    cm = params["w1"].shape[2]
    h2, w2 = h // 2, w // 2                      # MaxPool2d(2) floors odd H/W like torch
    dt = x.dtype

    # Free row-major regroup exposing the 2x2 pool window with static indexing.
    xr = x[:, :2 * h2, :2 * w2, :].reshape(n, h2, 2, w2, 2 * cin)

    th = _pick_row_tile(h2, w2, cin, cm) if row_tile is None else row_tile
    assert h2 % th == 0, f"row_tile {th} must divide pooled height {h2}"
    r_steps = h2 // th

    w1 = params["w1"].astype(jnp.bfloat16)
    w2b = params["w2"].astype(jnp.bfloat16)

    cparams = pltpu.CompilerParams(
        dimension_semantics=("parallel", "parallel"),
        vmem_limit_bytes=_VMEM_LIMIT)

    # ---- K1: maxpool(2) + conv1(3x3) + BN1 partial stats ----
    y1, s1 = pl.pallas_call(
        _pool_conv1_kernel,
        out_shape=(jax.ShapeDtypeStruct((n, h2, w2, cm), jnp.bfloat16),
                   jax.ShapeDtypeStruct((n, r_steps, 2, cm), jnp.float32)),
        grid=(n, r_steps),
        in_specs=[
            pl.BlockSpec((1, th, 2, w2, 2 * cin), lambda i, j: (i, j, 0, 0, 0)),
            pl.BlockSpec((1, 1, 2, w2, 2 * cin),
                         lambda i, j: (i, jnp.maximum(j * th - 1, 0), 0, 0, 0)),
            pl.BlockSpec((1, 1, 2, w2, 2 * cin),
                         lambda i, j: (i, jnp.minimum((j + 1) * th, h2 - 1), 0, 0, 0)),
            pl.BlockSpec((9, cin, cm), lambda i, j: (0, 0, 0)),
        ],
        out_specs=(
            pl.BlockSpec((1, th, w2, cm), lambda i, j: (i, j, 0, 0)),
            pl.BlockSpec((1, 1, 2, cm), lambda i, j: (i, j, 0, 0)),
        ),
        scratch_shapes=[pltpu.VMEM((th + 2, w2 + 2, cin), jnp.bfloat16)],
        compiler_params=cparams,
    )(xr, xr, xr, w1)

    sc1, sh1 = _fold_bn(s1, n * h2 * w2, params["gamma1"], params["beta1"], eps)

    # ---- K2: BN1 affine + LeakyReLU + (dropout p=0) + conv2(3x3) + BN2 stats ----
    y2, s2 = pl.pallas_call(
        _bn1_lrelu_conv2_kernel,
        out_shape=(jax.ShapeDtypeStruct((n, h2, w2, cm), jnp.bfloat16),
                   jax.ShapeDtypeStruct((n, r_steps, 2, cm), jnp.float32)),
        grid=(n, r_steps),
        in_specs=[
            pl.BlockSpec((1, th, w2, cm), lambda i, j: (i, j, 0, 0)),
            pl.BlockSpec((1, 1, w2, cm),
                         lambda i, j: (i, jnp.maximum(j * th - 1, 0), 0, 0)),
            pl.BlockSpec((1, 1, w2, cm),
                         lambda i, j: (i, jnp.minimum((j + 1) * th, h2 - 1), 0, 0)),
            pl.BlockSpec((1, cm), lambda i, j: (0, 0)),
            pl.BlockSpec((1, cm), lambda i, j: (0, 0)),
            pl.BlockSpec((9, cm, cm), lambda i, j: (0, 0, 0)),
        ],
        out_specs=(
            pl.BlockSpec((1, th, w2, cm), lambda i, j: (i, j, 0, 0)),
            pl.BlockSpec((1, 1, 2, cm), lambda i, j: (i, j, 0, 0)),
        ),
        scratch_shapes=[pltpu.VMEM((th + 2, w2 + 2, cm), jnp.bfloat16)],
        compiler_params=cparams,
    )(y1, y1, y1, sc1, sh1, w2b)

    # ---- epilogue (was K3): BN2 affine + LeakyReLU in plain jnp so XLA fuses it
    # with whatever consumes the output (here: the boundary transpose).
    sc2, sh2 = _fold_bn(s2, n * h2 * w2, params["gamma2"], params["beta2"], eps)
    z = y2.astype(jnp.float32) * sc2.reshape(1, 1, 1, cm) + sh2.reshape(1, 1, 1, cm)
    return jnp.where(z > 0, z, _LEAKY_SLOPE * z).astype(dt)


def down_block(x, params, *, eps=_BN_EPS, row_tile=None):
    """NCHW in / NCHW out wrapper matching the PyTorch module interface.

    The two transposes are boundary-only; in a full NHWC network they would be
    hoisted out of the block entirely (the kernels themselves are NHWC)."""
    x_nhwc = jnp.transpose(x, (0, 2, 3, 1))
    out = down_block_nhwc(x_nhwc, params, eps=eps, row_tile=row_tile)
    return jnp.transpose(out, (0, 3, 1, 2))


# ---------------- params & pure-JAX reference ----------------

def init_params(key, in_channels, out_channels):
    ks = jax.random.split(key, 8)
    ci, co = in_channels, out_channels
    return {
        # conv weights stored as (9, Cin, Cout) bf16: w[kh*3+kw] == torch_w[:, :, kh, kw].T
        "w1": (0.2 * jax.random.normal(ks[0], (9, ci, co), jnp.float32)).astype(jnp.bfloat16),
        "b1": 0.1 * jax.random.normal(ks[1], (co,), jnp.float32),   # reference only
        "gamma1": 1.0 + 0.1 * jax.random.normal(ks[2], (co,), jnp.float32),
        "beta1": 0.1 * jax.random.normal(ks[3], (co,), jnp.float32),
        "w2": (0.2 * jax.random.normal(ks[4], (9, co, co), jnp.float32)).astype(jnp.bfloat16),
        "b2": 0.1 * jax.random.normal(ks[5], (co,), jnp.float32),   # reference only
        "gamma2": 1.0 + 0.1 * jax.random.normal(ks[6], (co,), jnp.float32),
        "beta2": 0.1 * jax.random.normal(ks[7], (co,), jnp.float32),
    }


def _reference_down_block(x, params, eps=_BN_EPS):
    """Pure-JAX (XLA, f32 HIGHEST) reference.  Includes the conv biases, which the
    Pallas kernels omit (they cancel exactly under BatchNorm)."""
    xh = jnp.transpose(x, (0, 2, 3, 1))
    p = jax.lax.reduce_window(xh, -jnp.inf, jax.lax.max,
                              (1, 2, 2, 1), (1, 2, 2, 1), "VALID")

    def conv3x3(z, wmat, b):
        ci, co = wmat.shape[1], wmat.shape[2]
        w_hwio = wmat.astype(jnp.float32).reshape(3, 3, ci, co)
        return jax.lax.conv_general_dilated(
            z, w_hwio, (1, 1), ((1, 1), (1, 1)),
            dimension_numbers=("NHWC", "HWIO", "NHWC"),
            precision=jax.lax.Precision.HIGHEST) + b.reshape(1, 1, 1, co)

    def bn_lrelu(z, gamma, beta):
        mean = jnp.mean(z, axis=(0, 1, 2))
        var = jnp.mean((z - mean) ** 2, axis=(0, 1, 2))
        zh = (z - mean) * jax.lax.rsqrt(var + eps) * gamma + beta
        return jnp.where(zh > 0, zh, _LEAKY_SLOPE * zh)

    z = bn_lrelu(conv3x3(p, params["w1"], params["b1"]),
                 params["gamma1"], params["beta1"])
    z = bn_lrelu(conv3x3(z, params["w2"], params["b2"]),
                 params["gamma2"], params["beta2"])
    return jnp.transpose(z, (0, 3, 1, 2))


if __name__ == "__main__":
    key = jax.random.PRNGKey(0)
    kx, kp = jax.random.split(key)

    N, Cin, H, W = 2, 4, 16, 16
    Cout = 8
    # dropout_p = 0.0 (Dropout is identity) -- see TODO in _bn1_lrelu_conv2_kernel

    x = jax.random.normal(kx, (N, Cin, H, W), jnp.float32)
    params = init_params(kp, Cin, Cout)

    # row_tile=4 -> grid (N=2, row_tiles=2): exercises both the interior-halo and
    # image-border code paths (and gives the v7x 2-TC "parallel" axes some extent).
    fwd = jax.jit(lambda xx, pp: down_block(xx, pp, row_tile=4))
    out = jax.block_until_ready(fwd(x, params))

    assert out.shape == (N, Cout, H // 2, W // 2), out.shape
    assert bool(jnp.isfinite(out).all())

    ref = _reference_down_block(x, params)
    err = float(jnp.max(jnp.abs(out - ref)))
    # bf16 MXU operands + bf16 intermediates vs f32 HIGHEST reference.
    assert err < 1e-1, err

    print("KERNEL_OK")
</pallas_src>

<mosaic_0001>
module attributes {stable_mosaic.version = 11 : i64} {
  func.func @_pool_conv1_kernel(%arg0: i32, %arg1: i32, %arg2: memref<1x4x2x8x8xf32, #tpu.memory_space<vmem>>, %arg3: memref<1x1x2x8x8xf32, #tpu.memory_space<vmem>>, %arg4: memref<1x1x2x8x8xf32, #tpu.memory_space<vmem>>, %arg5: memref<9x4x8xbf16, #tpu.memory_space<vmem>>, %arg6: memref<1x4x8x8xbf16, #tpu.memory_space<vmem>>, %arg7: memref<1x1x2x8xf32, #tpu.memory_space<vmem>>, %arg8: memref<6x10x4xbf16, #tpu.memory_space<vmem>>) attributes {dimension_semantics = [#tpu.dimension_semantics<parallel>, #tpu.dimension_semantics<parallel>], iteration_bounds = array<i64: 2, 2>, scalar_prefetch = 0 : i64, scratch_operands = 1 : i64, tpu.core_type = #tpu.core_type<tc>, window_params = [{transform_indices = @transform_0, window_bounds = array<i64: 1, 4, 2, 8, 8>}, {transform_indices = @transform_1, window_bounds = array<i64: 1, 1, 2, 8, 8>}, {transform_indices = @transform_2, window_bounds = array<i64: 1, 1, 2, 8, 8>}, {pipeline_mode = #tpu.pipeline_mode<synchronous>, transform_indices = @transform_3, window_bounds = array<i64: 9, 4, 8>}, {transform_indices = @transform_4, window_bounds = array<i64: 1, 4, 8, 8>}, {transform_indices = @transform_5, window_bounds = array<i64: 1, 1, 2, 8>}]} {
    %c0 = arith.constant 0 : index
    %c0_0 = arith.constant 0 : index
    %c0_1 = arith.constant 0 : index
    %c0_2 = arith.constant 0 : index
    %c0_3 = arith.constant 0 : index
    %0 = vector.load %arg2[%c0, %c0_0, %c0_1, %c0_2, %c0_3] : memref<1x4x2x8x8xf32, #tpu.memory_space<vmem>>, vector<1x4x1x8x8xf32>
    %1 = vector.shape_cast %0 : vector<1x4x1x8x8xf32> to vector<4x8x8xf32>
    %c0_4 = arith.constant 0 : index
    %c0_5 = arith.constant 0 : index
    %c1 = arith.constant 1 : index
    %c0_6 = arith.constant 0 : index
    %c0_7 = arith.constant 0 : index
    %2 = vector.load %arg2[%c0_4, %c0_5, %c1, %c0_6, %c0_7] : memref<1x4x2x8x8xf32, #tpu.memory_space<vmem>>, vector<1x4x1x8x8xf32>
    %3 = vector.shape_cast %2 : vector<1x4x1x8x8xf32> to vector<4x8x8xf32>
    %4 = arith.maximumf %1, %3 : vector<4x8x8xf32>
    %5 = vector.extract_strided_slice %4 {offsets = [0, 0, 0], sizes = [4, 8, 4], strides = [1, 1, 1]} : vector<4x8x8xf32> to vector<4x8x4xf32>
    %6 = vector.extract_strided_slice %4 {offsets = [0, 0, 4], sizes = [4, 8, 4], strides = [1, 1, 1]} : vector<4x8x8xf32> to vector<4x8x4xf32>
    %7 = arith.maximumf %5, %6 : vector<4x8x4xf32>
    %c0_8 = arith.constant 0 : index
    %c0_9 = arith.constant 0 : index
    %c0_10 = arith.constant 0 : index
    %c0_11 = arith.constant 0 : index
    %c0_12 = arith.constant 0 : index
    %8 = vector.load %arg3[%c0_8, %c0_9, %c0_10, %c0_11, %c0_12] : memref<1x1x2x8x8xf32, #tpu.memory_space<vmem>>, vector<1x1x1x8x8xf32>
    %9 = vector.shape_cast %8 : vector<1x1x1x8x8xf32> to vector<8x8xf32>
    %c0_13 = arith.constant 0 : index
    %c0_14 = arith.constant 0 : index
    %c1_15 = arith.constant 1 : index
    %c0_16 = arith.constant 0 : index
    %c0_17 = arith.constant 0 : index
    %10 = vector.load %arg3[%c0_13, %c0_14, %c1_15, %c0_16, %c0_17] : memref<1x1x2x8x8xf32, #tpu.memory_space<vmem>>, vector<1x1x1x8x8xf32>
    %11 = vector.shape_cast %10 : vector<1x1x1x8x8xf32> to vector<8x8xf32>
    %12 = arith.maximumf %9, %11 : vector<8x8xf32>
    %13 = vector.extract_strided_slice %12 {offsets = [0, 0], sizes = [8, 4], strides = [1, 1]} : vector<8x8xf32> to vector<8x4xf32>
    %14 = vector.extract_strided_slice %12 {offsets = [0, 4], sizes = [8, 4], strides = [1, 1]} : vector<8x8xf32> to vector<8x4xf32>
    %15 = arith.maximumf %13, %14 : vector<8x4xf32>
    %c0_18 = arith.constant 0 : index
    %c0_19 = arith.constant 0 : index
    %c0_20 = arith.constant 0 : index
    %c0_21 = arith.constant 0 : index
    %c0_22 = arith.constant 0 : index
    %16 = vector.load %arg4[%c0_18, %c0_19, %c0_20, %c0_21, %c0_22] : memref<1x1x2x8x8xf32, #tpu.memory_space<vmem>>, vector<1x1x1x8x8xf32>
    %17 = vector.shape_cast %16 : vector<1x1x1x8x8xf32> to vector<8x8xf32>
    %c0_23 = arith.constant 0 : index
    %c0_24 = arith.constant 0 : index
    %c1_25 = arith.constant 1 : index
    %c0_26 = arith.constant 0 : index
    %c0_27 = arith.constant 0 : index
    %18 = vector.load %arg4[%c0_23, %c0_24, %c1_25, %c0_26, %c0_27] : memref<1x1x2x8x8xf32, #tpu.memory_space<vmem>>, vector<1x1x1x8x8xf32>
    %19 = vector.shape_cast %18 : vector<1x1x1x8x8xf32> to vector<8x8xf32>
    %20 = arith.maximumf %17, %19 : vector<8x8xf32>
    %21 = vector.extract_strided_slice %20 {offsets = [0, 0], sizes = [8, 4], strides = [1, 1]} : vector<8x8xf32> to vector<8x4xf32>
    %22 = vector.extract_strided_slice %20 {offsets = [0, 4], sizes = [8, 4], strides = [1, 1]} : vector<8x8xf32> to vector<8x4xf32>
    %23 = arith.maximumf %21, %22 : vector<8x4xf32>
    %cst = arith.constant 0.000000e+00 : bf16
    %24 = vector.broadcast %cst : bf16 to vector<6x10x4xbf16>
    %c0_28 = arith.constant 0 : index
    %c0_29 = arith.constant 0 : index
    %c0_30 = arith.constant 0 : index
    %25 = vector.load %arg8[%c0_28, %c0_29, %c0_30] : memref<6x10x4xbf16, #tpu.memory_space<vmem>>, vector<6x10x4xbf16>
    tpu.vector_store %arg8[%c0_28, %c0_29, %c0_30], %24 {strides = array<i32>} : memref<6x10x4xbf16, #tpu.memory_space<vmem>>, vector<6x10x4xbf16>,
    %26 = arith.truncf %7 : vector<4x8x4xf32> to vector<4x8x4xbf16>
    %c1_31 = arith.constant 1 : index
    %c1_32 = arith.constant 1 : index
    %c0_33 = arith.constant 0 : index
    %27 = vector.load %arg8[%c1_31, %c1_32, %c0_33] : memref<6x10x4xbf16, #tpu.memory_space<vmem>>, vector<4x8x4xbf16>
    tpu.vector_store %arg8[%c1_31, %c1_32, %c0_33], %26 {strides = array<i32>} : memref<6x10x4xbf16, #tpu.memory_space<vmem>>, vector<4x8x4xbf16>,
    %c0_i32 = arith.constant 0 : i32
    %28 = arith.cmpi sgt, %arg1, %c0_i32 : i32
    %cst_34 = arith.constant 0.000000e+00 : f32
    %29 = vector.broadcast %cst_34 : f32 to vector<8x4xf32>
    %30 = arith.select %28, %15, %29 : vector<8x4xf32>
    %31 = arith.truncf %30 : vector<8x4xf32> to vector<8x4xbf16>
    %32 = vector.shape_cast %31 : vector<8x4xbf16> to vector<1x8x4xbf16>
    %c0_35 = arith.constant 0 : index
    %c1_36 = arith.constant 1 : index
    %c0_37 = arith.constant 0 : index
    %33 = vector.load %arg8[%c0_35, %c1_36, %c0_37] : memref<6x10x4xbf16, #tpu.memory_space<vmem>>, vector<1x8x4xbf16>
    tpu.vector_store %arg8[%c0_35, %c1_36, %c0_37], %32 {strides = array<i32>} : memref<6x10x4xbf16, #tpu.memory_space<vmem>>, vector<1x8x4xbf16>,
    %c1_i32 = arith.constant 1 : i32
    %34 = arith.cmpi slt, %arg1, %c1_i32 : i32
    %cst_38 = arith.constant 0.000000e+00 : f32
    %35 = vector.broadcast %cst_38 : f32 to vector<8x4xf32>
    %36 = arith.select %34, %23, %35 : vector<8x4xf32>
    %37 = arith.truncf %36 : vector<8x4xf32> to vector<8x4xbf16>
    %38 = vector.shape_cast %37 : vector<8x4xbf16> to vector<1x8x4xbf16>
    %c5 = arith.constant 5 : index
    %c1_39 = arith.constant 1 : index
    %c0_40 = arith.constant 0 : index
    %39 = vector.load %arg8[%c5, %c1_39, %c0_40] : memref<6x10x4xbf16, #tpu.memory_space<vmem>>, vector<1x8x4xbf16>
    tpu.vector_store %arg8[%c5, %c1_39, %c0_40], %38 {strides = array<i32>} : memref<6x10x4xbf16, #tpu.memory_space<vmem>>, vector<1x8x4xbf16>,
    %cst_41 = arith.constant 0.000000e+00 : f32
    %40 = vector.broadcast %cst_41 : f32 to vector<32x8xf32>
    %c0_42 = arith.constant 0 : index
    %c0_43 = arith.constant 0 : index
    %c0_44 = arith.constant 0 : index
    %41 = vector.load %arg8[%c0_42, %c0_43, %c0_44] : memref<6x10x4xbf16, #tpu.memory_space<vmem>>, vector<4x8x4xbf16>
    %42 = vector.shape_cast %41 : vector<4x8x4xbf16> to vector<32x4xbf16>
    %c0_45 = arith.constant 0 : index
    %c0_46 = arith.constant 0 : index
    %c0_47 = arith.constant 0 : index
    %43 = vector.load %arg5[%c0_45, %c0_46, %c0_47] : memref<9x4x8xbf16, #tpu.memory_space<vmem>>, vector<1x4x8xbf16>
    %44 = vector.shape_cast %43 : vector<1x4x8xbf16> to vector<4x8xbf16>
    %cst_48 = arith.constant dense<0.000000e+00> : vector<32x8xf32>
    %45 = tpu.matmul %42, %44, %cst_48 {dimension_numbers = #tpu.dot_dimension_numbers<[1], [0], [0], [1], [0, 0, 1, 1], [], []>} : vector<32x4xbf16>, vector<4x8xbf16>, vector<32x8xf32> -> vector<32x8xf32>
    %46 = arith.addf %40, %45 : vector<32x8xf32>
    %c0_49 = arith.constant 0 : index
    %c1_50 = arith.constant 1 : index
    %c0_51 = arith.constant 0 : index
    %47 = vector.load %arg8[%c0_49, %c1_50, %c0_51] : memref<6x10x4xbf16, #tpu.memory_space<vmem>>, vector<4x8x4xbf16>
    %48 = vector.shape_cast %47 : vector<4x8x4xbf16> to vector<32x4xbf16>
    %c1_52 = arith.constant 1 : index
    %c0_53 = arith.constant 0 : index
    %c0_54 = arith.constant 0 : index
    %49 = vector.load %arg5[%c1_52, %c0_53, %c0_54] : memref<9x4x8xbf16, #tpu.memory_space<vmem>>, vector<1x4x8xbf16>
    %50 = vector.shape_cast %49 : vector<1x4x8xbf16> to vector<4x8xbf16>
    %cst_55 = arith.constant dense<0.000000e+00> : vector<32x8xf32>
    %51 = tpu.matmul %48, %50, %cst_55 {dimension_numbers = #tpu.dot_dimension_numbers<[1], [0], [0], [1], [0, 0, 1, 1], [], []>} : vector<32x4xbf16>, vector<4x8xbf16>, vector<32x8xf32> -> vector<32x8xf32>
    %52 = arith.addf %46, %51 : vector<32x8xf32>
    %c0_56 = arith.constant 0 : index
    %c2 = arith.constant 2 : index
    %c0_57 = arith.constant 0 : index
    %53 = vector.load %arg8[%c0_56, %c2, %c0_57] : memref<6x10x4xbf16, #tpu.memory_space<vmem>>, vector<4x8x4xbf16>
    %54 = vector.shape_cast %53 : vector<4x8x4xbf16> to vector<32x4xbf16>
    %c2_58 = arith.constant 2 : index
    %c0_59 = arith.constant 0 : index
    %c0_60 = arith.constant 0 : index
    %55 = vector.load %arg5[%c2_58, %c0_59, %c0_60] : memref<9x4x8xbf16, #tpu.memory_space<vmem>>, vector<1x4x8xbf16>
    %56 = vector.shape_cast %55 : vector<1x4x8xbf16> to vector<4x8xbf16>
    %cst_61 = arith.constant dense<0.000000e+00> : vector<32x8xf32>
    %57 = tpu.matmul %54, %56, %cst_61 {dimension_numbers = #tpu.dot_dimension_numbers<[1], [0], [0], [1], [0, 0, 1, 1], [], []>} : vector<32x4xbf16>, vector<4x8xbf16>, vector<32x8xf32> -> vector<32x8xf32>
    %58 = arith.addf %52, %57 : vector<32x8xf32>
    %c1_62 = arith.constant 1 : index
    %c0_63 = arith.constant 0 : index
    %c0_64 = arith.constant 0 : index
    %59 = vector.load %arg8[%c1_62, %c0_63, %c0_64] : memref<6x10x4xbf16, #tpu.memory_space<vmem>>, vector<4x8x4xbf16>
    %60 = vector.shape_cast %59 : vector<4x8x4xbf16> to vector<32x4xbf16>
    %c3 = arith.constant 3 : index
    %c0_65 = arith.constant 0 : index
    %c0_66 = arith.constant 0 : index
    %61 = vector.load %arg5[%c3, %c0_65, %c0_66] : memref<9x4x8xbf16, #tpu.memory_space<vmem>>, vector<1x4x8xbf16>
    %62 = vector.shape_cast %61 : vector<1x4x8xbf16> to vector<4x8xbf16>
    %cst_67 = arith.constant dense<0.000000e+00> : vector<32x8xf32>
    %63 = tpu.matmul %60, %62, %cst_67 {dimension_numbers = #tpu.dot_dimension_numbers<[1], [0], [0], [1], [0, 0, 1, 1], [], []>} : vector<32x4xbf16>, vector<4x8xbf16>, vector<32x8xf32> -> vector<32x8xf32>
    %64 = arith.addf %58, %63 : vector<32x8xf32>
    %c1_68 = arith.constant 1 : index
    %c1_69 = arith.constant 1 : index
    %c0_70 = arith.constant 0 : index
    %65 = vector.load %arg8[%c1_68, %c1_69, %c0_70] : memref<6x10x4xbf16, #tpu.memory_space<vmem>>, vector<4x8x4xbf16>
    %66 = vector.shape_cast %65 : vector<4x8x4xbf16> to vector<32x4xbf16>
    %c4 = arith.constant 4 : index
    %c0_71 = arith.constant 0 : index
    %c0_72 = arith.constant 0 : index
    %67 = vector.load %arg5[%c4, %c0_71, %c0_72] : memref<9x4x8xbf16, #tpu.memory_space<vmem>>, vector<1x4x8xbf16>
    %68 = vector.shape_cast %67 : vector<1x4x8xbf16> to vector<4x8xbf16>
    %cst_73 = arith.constant dense<0.000000e+00> : vector<32x8xf32>
    %69 = tpu.matmul %66, %68, %cst_73 {dimension_numbers = #tpu.dot_dimension_numbers<[1], [0], [0], [1], [0, 0, 1, 1], [], []>} : vector<32x4xbf16>, vector<4x8xbf16>, vector<32x8xf32> -> vector<32x8xf32>
    %70 = arith.addf %64, %69 : vector<32x8xf32>
    %c1_74 = arith.constant 1 : index
    %c2_75 = arith.constant 2 : index
    %c0_76 = arith.constant 0 : index
    %71 = vector.load %arg8[%c1_74, %c2_75, %c0_76] : memref<6x10x4xbf16, #tpu.memory_space<vmem>>, vector<4x8x4xbf16>
    %72 = vector.shape_cast %71 : vector<4x8x4xbf16> to vector<32x4xbf16>
    %c5_77 = arith.constant 5 : index
    %c0_78 = arith.constant 0 : index
    %c0_79 = arith.constant 0 : index
    %73 = vector.load %arg5[%c5_77, %c0_78, %c0_79] : memref<9x4x8xbf16, #tpu.memory_space<vmem>>, vector<1x4x8xbf16>
    %74 = vector.shape_cast %73 : vector<1x4x8xbf16> to vector<4x8xbf16>
    %cst_80 = arith.constant dense<0.000000e+00> : vector<32x8xf32>
    %75 = tpu.matmul %72, %74, %cst_80 {dimension_numbers = #tpu.dot_dimension_numbers<[1], [0], [0], [1], [0, 0, 1, 1], [], []>} : vector<32x4xbf16>, vector<4x8xbf16>, vector<32x8xf32> -> vector<32x8xf32>
    %76 = arith.addf %70, %75 : vector<32x8xf32>
    %c2_81 = arith.constant 2 : index
    %c0_82 = arith.constant 0 : index
    %c0_83 = arith.constant 0 : index
    %77 = vector.load %arg8[%c2_81, %c0_82, %c0_83] : memref<6x10x4xbf16, #tpu.memory_space<vmem>>, vector<4x8x4xbf16>
    %78 = vector.shape_cast %77 : vector<4x8x4xbf16> to vector<32x4xbf16>
    %c6 = arith.constant 6 : index
    %c0_84 = arith.constant 0 : index
    %c0_85 = arith.constant 0 : index
    %79 = vector.load %arg5[%c6, %c0_84, %c0_85] : memref<9x4x8xbf16, #tpu.memory_space<vmem>>, vector<1x4x8xbf16>
    %80 = vector.shape_cast %79 : vector<1x4x8xbf16> to vector<4x8xbf16>
    %cst_86 = arith.constant dense<0.000000e+00> : vector<32x8xf32>
    %81 = tpu.matmul %78, %80, %cst_86 {dimension_numbers = #tpu.dot_dimension_numbers<[1], [0], [0], [1], [0, 0, 1, 1], [], []>} : vector<32x4xbf16>, vector<4x8xbf16>, vector<32x8xf32> -> vector<32x8xf32>
    %82 = arith.addf %76, %81 : vector<32x8xf32>
    %c2_87 = arith.constant 2 : index
    %c1_88 = arith.constant 1 : index
    %c0_89 = arith.constant 0 : index
    %83 = vector.load %arg8[%c2_87, %c1_88, %c0_89] : memref<6x10x4xbf16, #tpu.memory_space<vmem>>, vector<4x8x4xbf16>
    %84 = vector.shape_cast %83 : vector<4x8x4xbf16> to vector<32x4xbf16>
    %c7 = arith.constant 7 : index
    %c0_90 = arith.constant 0 : index
    %c0_91 = arith.constant 0 : index
    %85 = vector.load %arg5[%c7, %c0_90, %c0_91] : memref<9x4x8xbf16, #tpu.memory_space<vmem>>, vector<1x4x8xbf16>
    %86 = vector.shape_cast %85 : vector<1x4x8xbf16> to vector<4x8xbf16>
    %cst_92 = arith.constant dense<0.000000e+00> : vector<32x8xf32>
    %87 = tpu.matmul %84, %86, %cst_92 {dimension_numbers = #tpu.dot_dimension_numbers<[1], [0], [0], [1], [0, 0, 1, 1], [], []>} : vector<32x4xbf16>, vector<4x8xbf16>, vector<32x8xf32> -> vector<32x8xf32>
    %88 = arith.addf %82, %87 : vector<32x8xf32>
    %c2_93 = arith.constant 2 : index
    %c2_94 = arith.constant 2 : index
    %c0_95 = arith.constant 0 : index
    %89 = vector.load %arg8[%c2_93, %c2_94, %c0_95] : memref<6x10x4xbf16, #tpu.memory_space<vmem>>, vector<4x8x4xbf16>
    %90 = vector.shape_cast %89 : vector<4x8x4xbf16> to vector<32x4xbf16>
    %c8 = arith.constant 8 : index
    %c0_96 = arith.constant 0 : index
    %c0_97 = arith.constant 0 : index
    %91 = vector.load %arg5[%c8, %c0_96, %c0_97] : memref<9x4x8xbf16, #tpu.memory_space<vmem>>, vector<1x4x8xbf16>
    %92 = vector.shape_cast %91 : vector<1x4x8xbf16> to vector<4x8xbf16>
    %cst_98 = arith.constant dense<0.000000e+00> : vector<32x8xf32>
    %93 = tpu.matmul %90, %92, %cst_98 {dimension_numbers = #tpu.dot_dimension_numbers<[1], [0], [0], [1], [0, 0, 1, 1], [], []>} : vector<32x4xbf16>, vector<4x8xbf16>, vector<32x8xf32> -> vector<32x8xf32>
    %94 = arith.addf %88, %93 : vector<32x8xf32>
    %95 = vector.shape_cast %94 : vector<32x8xf32> to vector<4x8x8xf32>
    %96 = arith.truncf %95 : vector<4x8x8xf32> to vector<4x8x8xbf16>
    %c0_99 = arith.constant 0 : index
    %c0_100 = arith.constant 0 : index
    %c0_101 = arith.constant 0 : index
    %c0_102 = arith.constant 0 : index
    %97 = vector.load %arg6[%c0_99, %c0_100, %c0_101, %c0_102] : memref<1x4x8x8xbf16, #tpu.memory_space<vmem>>, vector<1x4x8x8xbf16>
    %98 = vector.shape_cast %97 : vector<1x4x8x8xbf16> to vector<4x8x8xbf16>
    %99 = vector.shape_cast %96 : vector<4x8x8xbf16> to vector<1x4x8x8xbf16>
    tpu.vector_store %arg6[%c0_99, %c0_100, %c0_101, %c0_102], %99 {strides = array<i32>} : memref<1x4x8x8xbf16, #tpu.memory_space<vmem>>, vector<1x4x8x8xbf16>,
    %cst_103 = arith.constant dense<0.000000e+00> : vector<8xf32>
    %100 = vector.multi_reduction <add>, %94, %cst_103 [0] : vector<32x8xf32> to vector<8xf32>
    %101 = vector.shape_cast %100 : vector<8xf32> to vector<1x8xf32>
    %102 = arith.mulf %94, %94 : vector<32x8xf32>
    %cst_104 = arith.constant dense<0.000000e+00> : vector<8xf32>
    %103 = vector.multi_reduction <add>, %102, %cst_104 [0] : vector<32x8xf32> to vector<8xf32>
    %104 = vector.shape_cast %103 : vector<8xf32> to vector<1x8xf32>
    %105 = tpu.concatenate %101, %104 in 0 : vector<1x8xf32>, vector<1x8xf32> -> vector<2x8xf32>
    %106 = vector.shape_cast %105 : vector<2x8xf32> to vector<1x1x2x8xf32>
    %c0_105 = arith.constant 0 : index
    %c0_106 = arith.constant 0 : index
    %c0_107 = arith.constant 0 : index
    %c0_108 = arith.constant 0 : index
    %107 = vector.load %arg7[%c0_105, %c0_106, %c0_107, %c0_108] : memref<1x1x2x8xf32, #tpu.memory_space<vmem>>, vector<1x1x2x8xf32>
    tpu.vector_store %arg7[%c0_105, %c0_106, %c0_107, %c0_108], %106 {strides = array<i32>} : memref<1x1x2x8xf32, #tpu.memory_space<vmem>>, vector<1x1x2x8xf32>,
    return
  }
  func.func @transform_0(%arg0: i32, %arg1: i32) -> (i32, i32, i32, i32, i32) {
    %c0_i32 = arith.constant 0 : i32
    %c0_i32_0 = arith.constant 0 : i32
    %c0_i32_1 = arith.constant 0 : i32
    %c0_i32_2 = arith.constant 0 : i32
    return %arg0, %arg1, %c0_i32, %c0_i32_0, %c0_i32_1 : i32, i32, i32, i32, i32
  }
  func.func @transform_1(%arg0: i32, %arg1: i32) -> (i32, i32, i32, i32, i32) {
    %c4_i32 = arith.constant 4 : i32
    %0 = arith.muli %arg1, %c4_i32 : i32
    %c1_i32 = arith.constant 1 : i32
    %1 = arith.subi %0, %c1_i32 : i32
    %c0_i32 = arith.constant 0 : i32
    %2 = arith.maxsi %1, %c0_i32 : i32
    %c0_i32_0 = arith.constant 0 : i32
    %c0_i32_1 = arith.constant 0 : i32
    %c0_i32_2 = arith.constant 0 : i32
    %c0_i32_3 = arith.constant 0 : i32
    return %arg0, %2, %c0_i32_0, %c0_i32_1, %c0_i32_2 : i32, i32, i32, i32, i32
  }
  func.func @transform_2(%arg0: i32, %arg1: i32) -> (i32, i32, i32, i32, i32) {
    %c1_i32 = arith.constant 1 : i32
    %0 = arith.addi %arg1, %c1_i32 : i32
    %c4_i32 = arith.constant 4 : i32
    %1 = arith.muli %0, %c4_i32 : i32
    %c7_i32 = arith.constant 7 : i32
    %2 = arith.minsi %1, %c7_i32 : i32
    %c0_i32 = arith.constant 0 : i32
    %c0_i32_0 = arith.constant 0 : i32
    %c0_i32_1 = arith.constant 0 : i32
    %c0_i32_2 = arith.constant 0 : i32
    return %arg0, %2, %c0_i32, %c0_i32_0, %c0_i32_1 : i32, i32, i32, i32, i32
  }
  func.func @transform_3(%arg0: i32, %arg1: i32) -> (i32, i32, i32) {
    %c0_i32 = arith.constant 0 : i32
    %c0_i32_0 = arith.constant 0 : i32
    %c0_i32_1 = arith.constant 0 : i32
    %c0_i32_2 = arith.constant 0 : i32
    return %c0_i32, %c0_i32_0, %c0_i32_1 : i32, i32, i32
  }
  func.func @transform_4(%arg0: i32, %arg1: i32) -> (i32, i32, i32, i32) {
    %c0_i32 = arith.constant 0 : i32
    %c0_i32_0 = arith.constant 0 : i32
    %c0_i32_1 = arith.constant 0 : i32
    return %arg0, %arg1, %c0_i32, %c0_i32_0 : i32, i32, i32, i32
  }
  func.func @transform_5(%arg0: i32, %arg1: i32) -> (i32, i32, i32, i32) {
    %c0_i32 = arith.constant 0 : i32
    %c0_i32_0 = arith.constant 0 : i32
    %c0_i32_1 = arith.constant 0 : i32
    return %arg0, %arg1, %c0_i32, %c0_i32_0 : i32, i32, i32, i32
  }
}

module attributes {stable_mosaic.version = 11 : i64} {
  func.func @_bn1_lrelu_conv2_kernel(%arg0: i32, %arg1: i32, %arg2: memref<1x4x8x8xbf16, #tpu.memory_space<vmem>>, %arg3: memref<1x1x8x8xbf16, #tpu.memory_space<vmem>>, %arg4: memref<1x1x8x8xbf16, #tpu.memory_space<vmem>>, %arg5: memref<1x8xf32, #tpu.memory_space<vmem>>, %arg6: memref<1x8xf32, #tpu.memory_space<vmem>>, %arg7: memref<9x8x8xbf16, #tpu.memory_space<vmem>>, %arg8: memref<1x4x8x8xbf16, #tpu.memory_space<vmem>>, %arg9: memref<1x1x2x8xf32, #tpu.memory_space<vmem>>, %arg10: memref<6x10x8xbf16, #tpu.memory_space<vmem>>) attributes {dimension_semantics = [#tpu.dimension_semantics<parallel>, #tpu.dimension_semantics<parallel>], iteration_bounds = array<i64: 2, 2>, scalar_prefetch = 0 : i64, scratch_operands = 1 : i64, tpu.core_type = #tpu.core_type<tc>, window_params = [{transform_indices = @transform_0, window_bounds = array<i64: 1, 4, 8, 8>}, {transform_indices = @transform_1, window_bounds = array<i64: 1, 1, 8, 8>}, {transform_indices = @transform_2, window_bounds = array<i64: 1, 1, 8, 8>}, {pipeline_mode = #tpu.pipeline_mode<synchronous>, transform_indices = @transform_3, window_bounds = array<i64: 1, 8>}, {pipeline_mode = #tpu.pipeline_mode<synchronous>, transform_indices = @transform_4, window_bounds = array<i64: 1, 8>}, {pipeline_mode = #tpu.pipeline_mode<synchronous>, transform_indices = @transform_5, window_bounds = array<i64: 9, 8, 8>}, {transform_indices = @transform_6, window_bounds = array<i64: 1, 4, 8, 8>}, {transform_indices = @transform_7, window_bounds = array<i64: 1, 1, 2, 8>}]} {
    %c0 = arith.constant 0 : index
    %c0_0 = arith.constant 0 : index
    %0 = vector.load %arg5[%c0, %c0_0] : memref<1x8xf32, #tpu.memory_space<vmem>>, vector<1x8xf32>
    %c0_1 = arith.constant 0 : index
    %c0_2 = arith.constant 0 : index
    %1 = vector.load %arg6[%c0_1, %c0_2] : memref<1x8xf32, #tpu.memory_space<vmem>>, vector<1x8xf32>
    %c0_3 = arith.constant 0 : index
    %c0_4 = arith.constant 0 : index
    %c0_5 = arith.constant 0 : index
    %c0_6 = arith.constant 0 : index
    %2 = vector.load %arg2[%c0_3, %c0_4, %c0_5, %c0_6] : memref<1x4x8x8xbf16, #tpu.memory_space<vmem>>, vector<1x4x8x8xbf16>
    %3 = vector.shape_cast %2 : vector<1x4x8x8xbf16> to vector<4x8x8xbf16>
    %4 = arith.extf %3 : vector<4x8x8xbf16> to vector<4x8x8xf32>
    %5 = vector.shape_cast %0 : vector<1x8xf32> to vector<1x1x8xf32>
    %6 = vector.broadcast %5 : vector<1x1x8xf32> to vector<4x8x8xf32>
    %7 = arith.mulf %4, %6 : vector<4x8x8xf32>
    %8 = vector.shape_cast %1 : vector<1x8xf32> to vector<1x1x8xf32>
    %9 = vector.broadcast %8 : vector<1x1x8xf32> to vector<4x8x8xf32>
    %10 = arith.addf %7, %9 : vector<4x8x8xf32>
    %cst = arith.constant 0.000000e+00 : f32
    %11 = vector.broadcast %cst : f32 to vector<4x8x8xf32>
    %12 = arith.cmpf ogt, %10, %11 : vector<4x8x8xf32>
    %cst_7 = arith.constant 0.00999999977 : f32
    %13 = vector.broadcast %cst_7 : f32 to vector<4x8x8xf32>
    %14 = arith.mulf %13, %10 : vector<4x8x8xf32>
    %15 = arith.select %12, %10, %14 : vector<4x8x8xi1>, vector<4x8x8xf32>
    %c0_i32 = arith.constant 0 : i32
    %16 = arith.cmpi sgt, %arg1, %c0_i32 : i32
    %c0_8 = arith.constant 0 : index
    %c0_9 = arith.constant 0 : index
    %c0_10 = arith.constant 0 : index
    %c0_11 = arith.constant 0 : index
    %17 = vector.load %arg3[%c0_8, %c0_9, %c0_10, %c0_11] : memref<1x1x8x8xbf16, #tpu.memory_space<vmem>>, vector<1x1x8x8xbf16>
    %18 = vector.shape_cast %17 : vector<1x1x8x8xbf16> to vector<8x8xbf16>
    %19 = arith.extf %18 : vector<8x8xbf16> to vector<8x8xf32>
    %20 = vector.broadcast %0 : vector<1x8xf32> to vector<8x8xf32>
    %21 = arith.mulf %19, %20 : vector<8x8xf32>
    %22 = vector.broadcast %1 : vector<1x8xf32> to vector<8x8xf32>
    %23 = arith.addf %21, %22 : vector<8x8xf32>
    %cst_12 = arith.constant 0.000000e+00 : f32
    %24 = vector.broadcast %cst_12 : f32 to vector<8x8xf32>
    %25 = arith.cmpf ogt, %23, %24 : vector<8x8xf32>
    %cst_13 = arith.constant 0.00999999977 : f32
    %26 = vector.broadcast %cst_13 : f32 to vector<8x8xf32>
    %27 = arith.mulf %26, %23 : vector<8x8xf32>
    %28 = arith.select %25, %23, %27 : vector<8x8xi1>, vector<8x8xf32>
    %cst_14 = arith.constant 0.000000e+00 : f32
    %29 = vector.broadcast %cst_14 : f32 to vector<8x8xf32>
    %30 = arith.select %16, %28, %29 : vector<8x8xf32>
    %c1_i32 = arith.constant 1 : i32
    %31 = arith.cmpi slt, %arg1, %c1_i32 : i32
    %c0_15 = arith.constant 0 : index
    %c0_16 = arith.constant 0 : index
    %c0_17 = arith.constant 0 : index
    %c0_18 = arith.constant 0 : index
    %32 = vector.load %arg4[%c0_15, %c0_16, %c0_17, %c0_18] : memref<1x1x8x8xbf16, #tpu.memory_space<vmem>>, vector<1x1x8x8xbf16>
    %33 = vector.shape_cast %32 : vector<1x1x8x8xbf16> to vector<8x8xbf16>
    %34 = arith.extf %33 : vector<8x8xbf16> to vector<8x8xf32>
    %35 = vector.broadcast %0 : vector<1x8xf32> to vector<8x8xf32>
    %36 = arith.mulf %34, %35 : vector<8x8xf32>
    %37 = vector.broadcast %1 : vector<1x8xf32> to vector<8x8xf32>
    %38 = arith.addf %36, %37 : vector<8x8xf32>
    %cst_19 = arith.constant 0.000000e+00 : f32
    %39 = vector.broadcast %cst_19 : f32 to vector<8x8xf32>
    %40 = arith.cmpf ogt, %38, %39 : vector<8x8xf32>
    %cst_20 = arith.constant 0.00999999977 : f32
    %41 = vector.broadcast %cst_20 : f32 to vector<8x8xf32>
    %42 = arith.mulf %41, %38 : vector<8x8xf32>
    %43 = arith.select %40, %38, %42 : vector<8x8xi1>, vector<8x8xf32>
    %cst_21 = arith.constant 0.000000e+00 : f32
    %44 = vector.broadcast %cst_21 : f32 to vector<8x8xf32>
    %45 = arith.select %31, %43, %44 : vector<8x8xf32>
    %cst_22 = arith.constant 0.000000e+00 : bf16
    %46 = vector.broadcast %cst_22 : bf16 to vector<6x10x8xbf16>
    %c0_23 = arith.constant 0 : index
    %c0_24 = arith.constant 0 : index
    %c0_25 = arith.constant 0 : index
    %47 = vector.load %arg10[%c0_23, %c0_24, %c0_25] : memref<6x10x8xbf16, #tpu.memory_space<vmem>>, vector<6x10x8xbf16>
    tpu.vector_store %arg10[%c0_23, %c0_24, %c0_25], %46 {strides = array<i32>} : memref<6x10x8xbf16, #tpu.memory_space<vmem>>, vector<6x10x8xbf16>,
    %48 = arith.truncf %15 : vector<4x8x8xf32> to vector<4x8x8xbf16>
    %c1 = arith.constant 1 : index
    %c1_26 = arith.constant 1 : index
    %c0_27 = arith.constant 0 : index
    %49 = vector.load %arg10[%c1, %c1_26, %c0_27] : memref<6x10x8xbf16, #tpu.memory_space<vmem>>, vector<4x8x8xbf16>
    tpu.vector_store %arg10[%c1, %c1_26, %c0_27], %48 {strides = array<i32>} : memref<6x10x8xbf16, #tpu.memory_space<vmem>>, vector<4x8x8xbf16>,
    %50 = arith.truncf %30 : vector<8x8xf32> to vector<8x8xbf16>
    %51 = vector.shape_cast %50 : vector<8x8xbf16> to vector<1x8x8xbf16>
    %c0_28 = arith.constant 0 : index
    %c1_29 = arith.constant 1 : index
    %c0_30 = arith.constant 0 : index
    %52 = vector.load %arg10[%c0_28, %c1_29, %c0_30] : memref<6x10x8xbf16, #tpu.memory_space<vmem>>, vector<1x8x8xbf16>
    tpu.vector_store %arg10[%c0_28, %c1_29, %c0_30], %51 {strides = array<i32>} : memref<6x10x8xbf16, #tpu.memory_space<vmem>>, vector<1x8x8xbf16>,
    %53 = arith.truncf %45 : vector<8x8xf32> to vector<8x8xbf16>
    %54 = vector.shape_cast %53 : vector<8x8xbf16> to vector<1x8x8xbf16>
    %c5 = arith.constant 5 : index
    %c1_31 = arith.constant 1 : index
    %c0_32 = arith.constant 0 : index
    %55 = vector.load %arg10[%c5, %c1_31, %c0_32] : memref<6x10x8xbf16, #tpu.memory_space<vmem>>, vector<1x8x8xbf16>
    tpu.vector_store %arg10[%c5, %c1_31, %c0_32], %54 {strides = array<i32>} : memref<6x10x8xbf16, #tpu.memory_space<vmem>>, vector<1x8x8xbf16>,
    %cst_33 = arith.constant 0.000000e+00 : f32
    %56 = vector.broadcast %cst_33 : f32 to vector<32x8xf32>
    %c0_34 = arith.constant 0 : index
    %c0_35 = arith.constant 0 : index
    %c0_36 = arith.constant 0 : index
    %57 = vector.load %arg10[%c0_34, %c0_35, %c0_36] : memref<6x10x8xbf16, #tpu.memory_space<vmem>>, vector<4x8x8xbf16>
    %58 = vector.shape_cast %57 : vector<4x8x8xbf16> to vector<32x8xbf16>
    %c0_37 = arith.constant 0 : index
    %c0_38 = arith.constant 0 : index
    %c0_39 = arith.constant 0 : index
    %59 = vector.load %arg7[%c0_37, %c0_38, %c0_39] : memref<9x8x8xbf16, #tpu.memory_space<vmem>>, vector<1x8x8xbf16>
    %60 = vector.shape_cast %59 : vector<1x8x8xbf16> to vector<8x8xbf16>
    %cst_40 = arith.constant dense<0.000000e+00> : vector<32x8xf32>
    %61 = tpu.matmul %58, %60, %cst_40 {dimension_numbers = #tpu.dot_dimension_numbers<[1], [0], [0], [1], [0, 0, 1, 1], [], []>} : vector<32x8xbf16>, vector<8x8xbf16>, vector<32x8xf32> -> vector<32x8xf32>
    %62 = arith.addf %56, %61 : vector<32x8xf32>
    %c0_41 = arith.constant 0 : index
    %c1_42 = arith.constant 1 : index
    %c0_43 = arith.constant 0 : index
    %63 = vector.load %arg10[%c0_41, %c1_42, %c0_43] : memref<6x10x8xbf16, #tpu.memory_space<vmem>>, vector<4x8x8xbf16>
    %64 = vector.shape_cast %63 : vector<4x8x8xbf16> to vector<32x8xbf16>
    %c1_44 = arith.constant 1 : index
    %c0_45 = arith.constant 0 : index
    %c0_46 = arith.constant 0 : index
    %65 = vector.load %arg7[%c1_44, %c0_45, %c0_46] : memref<9x8x8xbf16, #tpu.memory_space<vmem>>, vector<1x8x8xbf16>
    %66 = vector.shape_cast %65 : vector<1x8x8xbf16> to vector<8x8xbf16>
    %cst_47 = arith.constant dense<0.000000e+00> : vector<32x8xf32>
    %67 = tpu.matmul %64, %66, %cst_47 {dimension_numbers = #tpu.dot_dimension_numbers<[1], [0], [0], [1], [0, 0, 1, 1], [], []>} : vector<32x8xbf16>, vector<8x8xbf16>, vector<32x8xf32> -> vector<32x8xf32>
    %68 = arith.addf %62, %67 : vector<32x8xf32>
    %c0_48 = arith.constant 0 : index
    %c2 = arith.constant 2 : index
    %c0_49 = arith.constant 0 : index
    %69 = vector.load %arg10[%c0_48, %c2, %c0_49] : memref<6x10x8xbf16, #tpu.memory_space<vmem>>, vector<4x8x8xbf16>
    %70 = vector.shape_cast %69 : vector<4x8x8xbf16> to vector<32x8xbf16>
    %c2_50 = arith.constant 2 : index
    %c0_51 = arith.constant 0 : index
    %c0_52 = arith.constant 0 : index
    %71 = vector.load %arg7[%c2_50, %c0_51, %c0_52] : memref<9x8x8xbf16, #tpu.memory_space<vmem>>, vector<1x8x8xbf16>
    %72 = vector.shape_cast %71 : vector<1x8x8xbf16> to vector<8x8xbf16>
    %cst_53 = arith.constant dense<0.000000e+00> : vector<32x8xf32>
    %73 = tpu.matmul %70, %72, %cst_53 {dimension_numbers = #tpu.dot_dimension_numbers<[1], [0], [0], [1], [0, 0, 1, 1], [], []>} : vector<32x8xbf16>, vector<8x8xbf16>, vector<32x8xf32> -> vector<32x8xf32>
    %74 = arith.addf %68, %73 : vector<32x8xf32>
    %c1_54 = arith.constant 1 : index
    %c0_55 = arith.constant 0 : index
    %c0_56 = arith.constant 0 : index
    %75 = vector.load %arg10[%c1_54, %c0_55, %c0_56] : memref<6x10x8xbf16, #tpu.memory_space<vmem>>, vector<4x8x8xbf16>
    %76 = vector.shape_cast %75 : vector<4x8x8xbf16> to vector<32x8xbf16>
    %c3 = arith.constant 3 : index
    %c0_57 = arith.constant 0 : index
    %c0_58 = arith.constant 0 : index
    %77 = vector.load %arg7[%c3, %c0_57, %c0_58] : memref<9x8x8xbf16, #tpu.memory_space<vmem>>, vector<1x8x8xbf16>
    %78 = vector.shape_cast %77 : vector<1x8x8xbf16> to vector<8x8xbf16>
    %cst_59 = arith.constant dense<0.000000e+00> : vector<32x8xf32>
    %79 = tpu.matmul %76, %78, %cst_59 {dimension_numbers = #tpu.dot_dimension_numbers<[1], [0], [0], [1], [0, 0, 1, 1], [], []>} : vector<32x8xbf16>, vector<8x8xbf16>, vector<32x8xf32> -> vector<32x8xf32>
    %80 = arith.addf %74, %79 : vector<32x8xf32>
    %c1_60 = arith.constant 1 : index
    %c1_61 = arith.constant 1 : index
    %c0_62 = arith.constant 0 : index
    %81 = vector.load %arg10[%c1_60, %c1_61, %c0_62] : memref<6x10x8xbf16, #tpu.memory_space<vmem>>, vector<4x8x8xbf16>
    %82 = vector.shape_cast %81 : vector<4x8x8xbf16> to vector<32x8xbf16>
    %c4 = arith.constant 4 : index
    %c0_63 = arith.constant 0 : index
    %c0_64 = arith.constant 0 : index
    %83 = vector.load %arg7[%c4, %c0_63, %c0_64] : memref<9x8x8xbf16, #tpu.memory_space<vmem>>, vector<1x8x8xbf16>
    %84 = vector.shape_cast %83 : vector<1x8x8xbf16> to vector<8x8xbf16>
    %cst_65 = arith.constant dense<0.000000e+00> : vector<32x8xf32>
    %85 = tpu.matmul %82, %84, %cst_65 {dimension_numbers = #tpu.dot_dimension_numbers<[1], [0], [0], [1], [0, 0, 1, 1], [], []>} : vector<32x8xbf16>, vector<8x8xbf16>, vector<32x8xf32> -> vector<32x8xf32>
    %86 = arith.addf %80, %85 : vector<32x8xf32>
    %c1_66 = arith.constant 1 : index
    %c2_67 = arith.constant 2 : index
    %c0_68 = arith.constant 0 : index
    %87 = vector.load %arg10[%c1_66, %c2_67, %c0_68] : memref<6x10x8xbf16, #tpu.memory_space<vmem>>, vector<4x8x8xbf16>
    %88 = vector.shape_cast %87 : vector<4x8x8xbf16> to vector<32x8xbf16>
    %c5_69 = arith.constant 5 : index
    %c0_70 = arith.constant 0 : index
    %c0_71 = arith.constant 0 : index
    %89 = vector.load %arg7[%c5_69, %c0_70, %c0_71] : memref<9x8x8xbf16, #tpu.memory_space<vmem>>, vector<1x8x8xbf16>
    %90 = vector.shape_cast %89 : vector<1x8x8xbf16> to vector<8x8xbf16>
    %cst_72 = arith.constant dense<0.000000e+00> : vector<32x8xf32>
    %91 = tpu.matmul %88, %90, %cst_72 {dimension_numbers = #tpu.dot_dimension_numbers<[1], [0], [0], [1], [0, 0, 1, 1], [], []>} : vector<32x8xbf16>, vector<8x8xbf16>, vector<32x8xf32> -> vector<32x8xf32>
    %92 = arith.addf %86, %91 : vector<32x8xf32>
    %c2_73 = arith.constant 2 : index
    %c0_74 = arith.constant 0 : index
    %c0_75 = arith.constant 0 : index
    %93 = vector.load %arg10[%c2_73, %c0_74, %c0_75] : memref<6x10x8xbf16, #tpu.memory_space<vmem>>, vector<4x8x8xbf16>
    %94 = vector.shape_cast %93 : vector<4x8x8xbf16> to vector<32x8xbf16>
    %c6 = arith.constant 6 : index
    %c0_76 = arith.constant 0 : index
    %c0_77 = arith.constant 0 : index
    %95 = vector.load %arg7[%c6, %c0_76, %c0_77] : memref<9x8x8xbf16, #tpu.memory_space<vmem>>, vector<1x8x8xbf16>
    %96 = vector.shape_cast %95 : vector<1x8x8xbf16> to vector<8x8xbf16>
    %cst_78 = arith.constant dense<0.000000e+00> : vector<32x8xf32>
    %97 = tpu.matmul %94, %96, %cst_78 {dimension_numbers = #tpu.dot_dimension_numbers<[1], [0], [0], [1], [0, 0, 1, 1], [], []>} : vector<32x8xbf16>, vector<8x8xbf16>, vector<32x8xf32> -> vector<32x8xf32>
    %98 = arith.addf %92, %97 : vector<32x8xf32>
    %c2_79 = arith.constant 2 : index
    %c1_80 = arith.constant 1 : index
    %c0_81 = arith.constant 0 : index
    %99 = vector.load %arg10[%c2_79, %c1_80, %c0_81] : memref<6x10x8xbf16, #tpu.memory_space<vmem>>, vector<4x8x8xbf16>
    %100 = vector.shape_cast %99 : vector<4x8x8xbf16> to vector<32x8xbf16>
    %c7 = arith.constant 7 : index
    %c0_82 = arith.constant 0 : index
    %c0_83 = arith.constant 0 : index
    %101 = vector.load %arg7[%c7, %c0_82, %c0_83] : memref<9x8x8xbf16, #tpu.memory_space<vmem>>, vector<1x8x8xbf16>
    %102 = vector.shape_cast %101 : vector<1x8x8xbf16> to vector<8x8xbf16>
    %cst_84 = arith.constant dense<0.000000e+00> : vector<32x8xf32>
    %103 = tpu.matmul %100, %102, %cst_84 {dimension_numbers = #tpu.dot_dimension_numbers<[1], [0], [0], [1], [0, 0, 1, 1], [], []>} : vector<32x8xbf16>, vector<8x8xbf16>, vector<32x8xf32> -> vector<32x8xf32>
    %104 = arith.addf %98, %103 : vector<32x8xf32>
    %c2_85 = arith.constant 2 : index
    %c2_86 = arith.constant 2 : index
    %c0_87 = arith.constant 0 : index
    %105 = vector.load %arg10[%c2_85, %c2_86, %c0_87] : memref<6x10x8xbf16, #tpu.memory_space<vmem>>, vector<4x8x8xbf16>
    %106 = vector.shape_cast %105 : vector<4x8x8xbf16> to vector<32x8xbf16>
    %c8 = arith.constant 8 : index
    %c0_88 = arith.constant 0 : index
    %c0_89 = arith.constant 0 : index
    %107 = vector.load %arg7[%c8, %c0_88, %c0_89] : memref<9x8x8xbf16, #tpu.memory_space<vmem>>, vector<1x8x8xbf16>
    %108 = vector.shape_cast %107 : vector<1x8x8xbf16> to vector<8x8xbf16>
    %cst_90 = arith.constant dense<0.000000e+00> : vector<32x8xf32>
    %109 = tpu.matmul %106, %108, %cst_90 {dimension_numbers = #tpu.dot_dimension_numbers<[1], [0], [0], [1], [0, 0, 1, 1], [], []>} : vector<32x8xbf16>, vector<8x8xbf16>, vector<32x8xf32> -> vector<32x8xf32>
    %110 = arith.addf %104, %109 : vector<32x8xf32>
    %111 = vector.shape_cast %110 : vector<32x8xf32> to vector<4x8x8xf32>
    %112 = arith.truncf %111 : vector<4x8x8xf32> to vector<4x8x8xbf16>
    %c0_91 = arith.constant 0 : index
    %c0_92 = arith.constant 0 : index
    %c0_93 = arith.constant 0 : index
    %c0_94 = arith.constant 0 : index
    %113 = vector.load %arg8[%c0_91, %c0_92, %c0_93, %c0_94] : memref<1x4x8x8xbf16, #tpu.memory_space<vmem>>, vector<1x4x8x8xbf16>
    %114 = vector.shape_cast %113 : vector<1x4x8x8xbf16> to vector<4x8x8xbf16>
    %115 = vector.shape_cast %112 : vector<4x8x8xbf16> to vector<1x4x8x8xbf16>
    tpu.vector_store %arg8[%c0_91, %c0_92, %c0_93, %c0_94], %115 {strides = array<i32>} : memref<1x4x8x8xbf16, #tpu.memory_space<vmem>>, vector<1x4x8x8xbf16>,
    %cst_95 = arith.constant dense<0.000000e+00> : vector<8xf32>
    %116 = vector.multi_reduction <add>, %110, %cst_95 [0] : vector<32x8xf32> to vector<8xf32>
    %117 = vector.shape_cast %116 : vector<8xf32> to vector<1x8xf32>
    %118 = arith.mulf %110, %110 : vector<32x8xf32>
    %cst_96 = arith.constant dense<0.000000e+00> : vector<8xf32>
    %119 = vector.multi_reduction <add>, %118, %cst_96 [0] : vector<32x8xf32> to vector<8xf32>
    %120 = vector.shape_cast %119 : vector<8xf32> to vector<1x8xf32>
    %121 = tpu.concatenate %117, %120 in 0 : vector<1x8xf32>, vector<1x8xf32> -> vector<2x8xf32>
    %122 = vector.shape_cast %121 : vector<2x8xf32> to vector<1x1x2x8xf32>
    %c0_97 = arith.constant 0 : index
    %c0_98 = arith.constant 0 : index
    %c0_99 = arith.constant 0 : index
    %c0_100 = arith.constant 0 : index
    %123 = vector.load %arg9[%c0_97, %c0_98, %c0_99, %c0_100] : memref<1x1x2x8xf32, #tpu.memory_space<vmem>>, vector<1x1x2x8xf32>
    tpu.vector_store %arg9[%c0_97, %c0_98, %c0_99, %c0_100], %122 {strides = array<i32>} : memref<1x1x2x8xf32, #tpu.memory_space<vmem>>, vector<1x1x2x8xf32>,
    return
  }
  func.func @transform_0(%arg0: i32, %arg1: i32) -> (i32, i32, i32, i32) {
    %c0_i32 = arith.constant 0 : i32
    %c0_i32_0 = arith.constant 0 : i32
    %c0_i32_1 = arith.constant 0 : i32
    return %arg0, %arg1, %c0_i32, %c0_i32_0 : i32, i32, i32, i32
  }
  func.func @transform_1(%arg0: i32, %arg1: i32) -> (i32, i32, i32, i32) {
    %c4_i32 = arith.constant 4 : i32
    %0 = arith.muli %arg1, %c4_i32 : i32
    %c1_i32 = arith.constant 1 : i32
    %1 = arith.subi %0, %c1_i32 : i32
    %c0_i32 = arith.constant 0 : i32
    %2 = arith.maxsi %1, %c0_i32 : i32
    %c0_i32_0 = arith.constant 0 : i32
    %c0_i32_1 = arith.constant 0 : i32
    %c0_i32_2 = arith.constant 0 : i32
    return %arg0, %2, %c0_i32_0, %c0_i32_1 : i32, i32, i32, i32
  }
  func.func @transform_2(%arg0: i32, %arg1: i32) -> (i32, i32, i32, i32) {
    %c1_i32 = arith.constant 1 : i32
    %0 = arith.addi %arg1, %c1_i32 : i32
    %c4_i32 = arith.constant 4 : i32
    %1 = arith.muli %0, %c4_i32 : i32
    %c7_i32 = arith.constant 7 : i32
    %2 = arith.minsi %1, %c7_i32 : i32
    %c0_i32 = arith.constant 0 : i32
    %c0_i32_0 = arith.constant 0 : i32
    %c0_i32_1 = arith.constant 0 : i32
    return %arg0, %2, %c0_i32, %c0_i32_0 : i32, i32, i32, i32
  }
  func.func @transform_3(%arg0: i32, %arg1: i32) -> (i32, i32) {
    %c0_i32 = arith.constant 0 : i32
    %c0_i32_0 = arith.constant 0 : i32
    %c0_i32_1 = arith.constant 0 : i32
    return %c0_i32, %c0_i32_0 : i32, i32
  }
  func.func @transform_4(%arg0: i32, %arg1: i32) -> (i32, i32) {
    %c0_i32 = arith.constant 0 : i32
    %c0_i32_0 = arith.constant 0 : i32
    %c0_i32_1 = arith.constant 0 : i32
    return %c0_i32, %c0_i32_0 : i32, i32
  }
  func.func @transform_5(%arg0: i32, %arg1: i32) -> (i32, i32, i32) {
    %c0_i32 = arith.constant 0 : i32
    %c0_i32_0 = arith.constant 0 : i32
    %c0_i32_1 = arith.constant 0 : i32
    %c0_i32_2 = arith.constant 0 : i32
    return %c0_i32, %c0_i32_0, %c0_i32_1 : i32, i32, i32
  }
  func.func @transform_6(%arg0: i32, %arg1: i32) -> (i32, i32, i32, i32) {
    %c0_i32 = arith.constant 0 : i32
    %c0_i32_0 = arith.constant 0 : i32
    %c0_i32_1 = arith.constant 0 : i32
    return %arg0, %arg1, %c0_i32, %c0_i32_0 : i32, i32, i32, i32
  }
  func.func @transform_7(%arg0: i32, %arg1: i32) -> (i32, i32, i32, i32) {
    %c0_i32 = arith.constant 0 : i32
    %c0_i32_0 = arith.constant 0 : i32
    %c0_i32_1 = arith.constant 0 : i32
    return %arg0, %arg1, %c0_i32, %c0_i32_0 : i32, i32, i32, i32
  }
}

</mosaic_0001>

<bundles_post_ra>
// kernel: _lambda_.3
= control target key start
LH: loop header
LB: loop body
LE: loop exit
PB: predicated region body
PF: predicated region fallthrough
CT: control target
= control target key end

     0   :  { %s2180_s24 = smov 0   ;;  %s2182_s25 = smov 0   ;;  %s2579_s0 = inlined_call_operand.vmem [shape: bf16[2,8,8,8], index: 0, kind: input, shape index: {}, may-alias: {0,1,2}]   ;;  %s2580_s1 = inlined_call_operand.vmem [shape: bf16[2,8,8,8], index: 1, kind: input, shape index: {}, may-alias: {0,1,2}]   ;;  %s2581_s2 = inlined_call_operand.vmem [shape: bf16[2,8,8,8], index: 2, kind: input, shape index: {}, may-alias: {0,1,2}]   ;;  %s2582_s3 = inlined_call_operand.vmem [shape: f32[1,8], index: 3, kind: input, shape index: {}]   ;;  %s2583_s4 = inlined_call_operand.vmem [shape: f32[1,8], index: 4, kind: input, shape index: {}]   ;;  %s2584_s5 = inlined_call_operand.vmem [shape: bf16[9,8,8], index: 5, kind: input, shape index: {}]   ;;  %s2585_s6 = inlined_call_operand.vmem [shape: bf16[2,8,8,8], index: 6, kind: output, shape index: {0}]   ;;  %s2586_s7 = inlined_call_operand.vmem [shape: f32[2,2,2,8], index: 7, kind: output, shape index: {1}]  }
   0x1   :  { %s2184_s26 = smov 0   ;;  %s2186_s27 = smov 0  }
   0x2   :  { %s2188_s28 = smov 0  }
   0x3 LB: > { %s27_s29 = sadd.s32 1, %s2129_s26  ;;  %s30_s30 = sadd.s32 1, %s2133_s27  ;;  %s2137_s28 = sphi %s2188_s28, %s18_s28   ;;  %s2133_s27 = sphi %s2186_s27, %s2601_s27   ;;  %s2129_s26 = sphi %s2184_s26, %s2600_s26   ;;  %s2125_s25 = sphi %s2182_s25, %s2599_s25   ;;  %s2121_s24 = sphi %s2180_s24, %s2598_s24  }
   0x4   : > { %p28_p0 = scmp.ge.s32.totalorder %s27_s29, 2  ;;  %p1817_p1 = scmp.ge.s32.totalorder %s2137_s28, 1 }
   0x5   : > { %p325_p2 = scmp.lt.s32.totalorder %s2137_s28, 5 }
   0x6   : > { %s2603_s29 = smov (%p28_p0, %s27_s29), 0  ;;  %s2605_s30 = smov (!%p28_p0, %s30_s30), %s2133_s27 }
   0x7   : > { %p326_p3 = pnand %p1817_p1, %p325_p2  ;;  %p32_p4 = scmp.ge.s32.totalorder %s2605_s30, 2 }
   0x8   : > { %vm749_vm0 = vcmask (!%p326_p3), 1043456   ;;  %v1872_v0 = vld [vmem:[%s2584_s5 + $0x10] sm:$0xf] (!%p326_p3)  ;;  %s2216_s10 = sshll.u32 (!%p326_p3), %s2121_s24, 2  ;;  %p398_p5 = scmp.lt.s32.totalorder (!%p326_p3), %s2125_s25, 1  ;;  %vm524_vm1 = vcmask (!%p326_p3), 60416  }
   0x9   : > { %s2607_s30 = smov (%p32_p4, %s2605_s30), 0  ;;  %329 = sbr.rel (%p326_p3) target bundleno = 361 (0x169), region = 44 }
   0xa   : > { %2047 = vmatprep.subr.msk.bf16.mxu0 (!%p326_p3), %vm749_vm0, %v1872_v0  ;;  %v1128_v1 = vsel (!%p326_p3), %vm749_vm0, %v1872_v0, 0  ;;  %p400_p6 = scmp.lt.s32.totalorder (!%p326_p3), %s2216_s10, 7  ;;  %vm526_vm2 = vcmask (!%p326_p3), 57344   ;;  %v2139_v2 = vmov (!%p326_p3), 0   ;;  %v2242_v3 = vld [vmem:[%s2584_s5 + $0x14] sm:$0xf] (!%p326_p3) }
   0xb   : > { %1982 = vmatpush3.bf16.msra.mxu0 (!%p326_p3), %v1128_v1  ;;  %528 = vst.msk [vmem:[#allocation2 + $0x8] sm:$0xf] (!%p326_p3), %vm524_vm1, %v2139_v2  ;;  %530 = vst.msk [vmem:[#allocation2 + $0x10] sm:$0xf] (!%p326_p3), %vm524_vm1, %v2139_v2  ;;  %s1822_s15 = sadd.s32 (!%p326_p3), 4294967295, %s2216_s10  ;;  %s1914_s18 = sadd.s32 (!%p326_p3), 4, %s2216_s10 }
   0xc   : > { %529 = vst.msk [vmem:[#allocation2 + $0xc] sm:$0x1] (!%p326_p3), %vm526_vm2, %v2139_v2  ;;  %531 = vst.msk [vmem:[#allocation2 + $0x14] sm:$0x1] (!%p326_p3), %vm526_vm2, %v2139_v2  ;;  %2048 = vmatprep.subr.msk.bf16.mxu0 (!%p326_p3), %vm749_vm0, %v2242_v3  ;;  %v1849_v4 = vld [vmem:[%s2584_s5 + $0x4] sm:$0xf] (!%p326_p3) }
   0xd   : > { %525 = vst.msk [vmem:[#allocation2] sm:$0xf] (!%p326_p3), %vm524_vm1, %v2139_v2  ;;  %532 = vst.msk [vmem:[#allocation2 + $0x18] sm:$0xf] (!%p326_p3), %vm524_vm1, %v2139_v2  ;;  %p409_p7 = scmp.gt.s32.totalorder (!%p326_p3), %s1822_s15, 0  ;;  %2043 = vmatprep.subr.msk.bf16.mxu1 (!%p326_p3), %vm749_vm0, %v1849_v4  ;;  %v751_v6 = vsel (!%p326_p3), %vm749_vm0, %v1849_v4, 0 }
   0xe   : > { %527 = vst.msk [vmem:[#allocation2 + $0x4] sm:$0x1] (!%p326_p3), %vm526_vm2, %v2139_v2  ;;  %533 = vst.msk [vmem:[#allocation2 + $0x1c] sm:$0x1] (!%p326_p3), %vm526_vm2, %v2139_v2  ;;  %v2254_v5 = vld [vmem:[%s2584_s5] sm:$0xf] (!%p326_p3)  ;;  %1958 = vmatpush3.bf16.msra.mxu1 (!%p326_p3), %v751_v6 }
   0xf   : > { %534 = vst.msk [vmem:[#allocation2 + $0x20] sm:$0xf] (!%p326_p3), %vm524_vm1, %v2139_v2  ;;  %536 = vst.msk [vmem:[#allocation2 + $0x28] sm:$0xf] (!%p326_p3), %vm524_vm1, %v2139_v2  ;;  %p1823_p8 = scmp.lt.s32.totalorder (!%p326_p3), %s1822_s15, 7  ;;  %2044 = vmatprep.subr.msk.bf16.mxu1 (!%p326_p3), %vm749_vm0, %v2254_v5  ;;  %p2292_p9 = scmp.lt.s32.totalorder (!%p326_p3), %s1914_s18, 7 }
  0x10   : > { %s2609_s25 = smov (!%p398_p5, %s2125_s25), 1  ;;  %535 = vst.msk [vmem:[#allocation2 + $0x24] sm:$0x1] %vm526_vm2, %v2139_v2  ;;  %537 = vst.msk [vmem:[#allocation2 + $0x2c] sm:$0x1] %vm526_vm2, %v2139_v2  ;;  %p500_p10 = scmp.gt.s32.totalorder %s2121_s24, 0 }
  0x11   : > { %s401_s11 = scalar_select %p400_p6, %s2216_s10, 7  ;;  %v2267_v7 = vld [vmem:[%s2582_s3] ss:$0 sm:$0xff]  ;;  %vm596_vm7 = vsmask.f32 7938  ;;  %vm742_vm15 = vcmask 64512  }
  0x12   : > { %s2237_s12 = sshll.u32 %s2609_s25, 3  ;;  %v2274_v14 = vld [vmem:[%s2583_s4] ss:$0 sm:$0xff]  ;;  %vm602_vm8 = vsmask.f32 256  ;;  %vm2299_vm9 = vmand %vm524_vm1, %vm596_vm7  ;;  %s2613_s18 = smov (!%p2292_p9, %s1914_s18), 7 }
  0x13   : > { %s403_s16 = sadd.s32 %s2237_s12, %s401_s11  ;;  %v598_v40 = vld [vmem:[#allocation2 + $0x8] sm:$0xf]  ;;  %v604_v41 = vld [vmem:[#allocation2 + $0xc] sm:$0x1]  ;;  %v607_v42 = vld [vmem:[#allocation2 + $0x10] sm:$0xf] }
  0x14   : > { %s2256_s21 = sshll.u32 %s403_s16, 2  ;;  %v610_v50 = vld [vmem:[#allocation2 + $0x14] sm:$0x1]  ;;  %vm2311_vm10 = vmand %vm526_vm2, %vm602_vm8  ;;  %v613_v54 = vld [vmem:[#allocation2 + $0x18] sm:$0xf]  ;;  %s2615_s18 = smov (!%p2292_p9, %s2613_s18), 7 }
  0x15   : > { %s405_s8 = scalar_lea.vmem %s2579_s0, %s2256_s21  ;;  %v616_v55 = vld [vmem:[#allocation2 + $0x1c] sm:$0x1]  ;;  %vm675_vm11 = vsmask.f32 3328  ;;  %vm676_vm12 = vsmask.f32 7440  ;;  %s447_s11 = scalar_lea.vmem %s2585_s6, %s2256_s21 }
  0x16   : > { %v1922_v8 = vld [vmem:[%s405_s8] sm:$0xff]   ;;  %v1929_v9 = vld [vmem:[%s405_s8 + $0x8] sm:$0xff]   ;;  %s410_s13 = scalar_select %p409_p7, %s1822_s15, 0  ;;  %vm2359_vm2 = vmor %vm675_vm11, %vm676_vm12 }
  0x17   : > { %v1923_v10 = vunpack.c.l.bf16 %v1922_v8  ;;  %v1924_v11 = vunpack.c.h.bf16 %v1922_v8  ;;  %v1927_v12 = vunpack.c.l.bf16 %v1929_v9  ;;  %v1928_v13 = vunpack.c.h.bf16 %v1929_v9  ;;  %v619_v61 = vld [vmem:[#allocation2 + $0x20] sm:$0xf]  ;;  %v622_v62 = vld [vmem:[#allocation2 + $0x24] sm:$0x1]  ;;  %s508_s10 = scalar_select %p500_p10, 1, 0 }
  0x18   : > { %s2611_s13 = smov (!%p1823_p8, %s410_s13), 7  ;;  %s432_s8 = sadd.s32 %s2237_s12, %s2615_s18 }
  0x19   : > { %v474_v15 = vmul.f32 %v1923_v10, %v2267_v7  ;;  %v475_v16 = vmul.f32 %v1924_v11, %v2267_v7  ;;  %v476_v17 = vmul.f32 %v1927_v12, %v2267_v7  ;;  %v477_v18 = vmul.f32 %v1928_v13, %v2267_v7  ;;  %s416_s17 = sadd.s32 %s2611_s13, %s2237_s12  ;;  %s1835_s9 = sshll.u32 %s432_s8, 2 }
  0x1a   : > { %s1829_s15 = sshll.u32 %s416_s17, 2  ;;  %s434_s13 = scalar_lea.vmem %s2581_s2, %s1835_s9 }
  0x1b   : > { %v484_v19 = vadd.f32 %v2274_v14, %v474_v15  ;;  %v485_v20 = vadd.f32 %v2274_v14, %v475_v16  ;;  %v486_v21 = vadd.f32 %v2274_v14, %v476_v17  ;;  %v487_v22 = vadd.f32 %v2274_v14, %v477_v18  ;;  %s418_s22 = scalar_lea.vmem %s2580_s1, %s1829_s15  ;;  %p451_p11 = scmp.lt.s32.totalorder %s2121_s24, 1 }
  0x1c   : > { %v501_v39 = vld [vmem:[%s418_s22] sm:$0xf]  ;;  %v509_v17 = vstv %s508_s10  ;;  %s1839_s21 = sshll.u32 %s2609_s25, 1 }
  0x1d   : > { %vm488_vm3 = vcmp.gt.f32.partialorder %v484_v19, 0.0  ;;  %vm489_vm4 = vcmp.gt.f32.partialorder %v485_v20, 0.0  ;;  %v492_v23 = vmul.f32 0.01, %v484_v19  ;;  %v493_v24 = vmul.f32 0.01, %v485_v20 }
  0x1e   : > { %vm490_vm5 = vcmp.gt.f32.partialorder %v486_v21, 0.0  ;;  %vm491_vm6 = vcmp.gt.f32.partialorder %v487_v22, 0.0  ;;  %v494_v25 = vmul.f32 0.01, %v486_v21  ;;  %v495_v26 = vmul.f32 0.01, %v487_v22 }
  0x1f   : > { %v496_v27 = vsel %vm488_vm3, %v484_v19, %v492_v23  ;;  %v497_v28 = vsel %vm489_vm4, %v485_v20, %v493_v24  ;;  %v502_v56 = vunpack.c.l.bf16 %v501_v39  ;;  %vm2339_vm14 = vcmp.eq.s32.totalorder %v509_v17, 1  ;;  %s2395_s17 = scalar_select %p451_p11, 1, 0 }
  0x20   : > { %v1915_v29 = vpack.c.bf16 %v496_v27, %v496_v27  ;;  %v1916_v30 = vpack.c.bf16 %v497_v28, %v497_v28  ;;  %v498_v31 = vsel %vm490_vm5, %v486_v21, %v494_v25  ;;  %v499_v32 = vsel %vm491_vm6, %v487_v22, %v495_v26  ;;  %s2617_s24 = smov (!%p451_p11, %s2121_s24), 1 }
  0x21   : > { %v1917_v33 = vpack.c.bf16 %v498_v31, %v498_v31  ;;  %v1918_v34 = vpack.c.bf16 %v499_v32, %v499_v32  ;;  %v503_v15 = vmul.f32 %v2267_v7, %v502_v56  ;;  %vm882_vm3 = vcmask 1042432  }
  0x22   : > { %v555_v35 = vshrl.u32 %v1915_v29, 16  ;;  %v558_v36 = vshll.u32 %v1915_v29, 16  ;;  %v563_v37 = vshrl.u32 %v1916_v30, 16  ;;  %v566_v38 = vshll.u32 %v1916_v30, 16 }
  0x23   : > { %v571_v43 = vshrl.u32 %v1917_v33, 16  ;;  %v574_v44 = vshll.u32 %v1917_v33, 16  ;;  %v579_v45 = vshrl.u32 %v1918_v34, 16  ;;  %v582_v46 = vshll.u32 %v1918_v34, 16 }
  0x24   : > { %v557_v47 = vrot.slane %v555_v35, 7  ;;  %v565_v48 = vrot.slane %v563_v37, 7  ;;  %v504_v16 = vadd.f32 %v2274_v14, %v503_v15  ;;  %vm883_vm4 = vcmask 1046532  }
  0x25   : > { %v573_v52 = vrot.slane %v571_v43, 7  ;;  %v581_v53 = vrot.slane %v579_v45, 7  ;;  %vm2421_vm5 = vmor %vm882_vm3, %vm883_vm4 }
  0x26   : > { %v560_v57 = vor.u32 %v558_v36, %v557_v47  ;;  %v561_v58 = vrot.slane %v557_v47, 4  ;;  %v568_v59 = vor.u32 %v566_v38, %v565_v48  ;;  %v569_v60 = vrot.slane %v565_v48, 4 }
  0x27   : > { %v576_v63 = vor.u32 %v574_v44, %v573_v52  ;;  %v577_v0 = vrot.slane %v573_v52, 4  ;;  %v584_v1 = vor.u32 %v582_v46, %v581_v53  ;;  %v585_v2 = vrot.slane %v581_v53, 4 }
  0x28   : > { %v599_v4 = vsel %vm2299_vm9, %v560_v57, %v598_v40  ;;  %v605_v6 = vsel %vm2311_vm10, %v561_v58, %v604_v41  ;;  %v608_v8 = vsel %vm2299_vm9, %v568_v59, %v607_v42  ;;  %v611_v9 = vsel %vm2311_vm10, %v569_v60, %v610_v50  ;;  %v513_v50 = vld [vmem:[%s434_s13] sm:$0xf]  ;;  %s454_s13 = sadd.s32 %s1839_s21, %s2617_s24 }
  0x29   : > { %600 = vst [vmem:[#allocation2 + $0x8] sm:$0xf] %v599_v4  ;;  %606 = vst [vmem:[#allocation2 + $0xc] sm:$0x1] %v605_v6  ;;  %v614_v10 = vsel %vm2299_vm9, %v576_v63, %v613_v54  ;;  %v617_v11 = vsel %vm2311_vm10, %v577_v0, %v616_v55  ;;  %v620_v12 = vsel %vm2299_vm9, %v584_v1, %v619_v61  ;;  %vm505_vm13 = vcmp.gt.f32.partialorder %v504_v16, 0.0  ;;  %s1840_s14 = sshll.u32 %s454_s13, 1 }
  0x2a   : > { %609 = vst [vmem:[#allocation2 + $0x10] sm:$0xf] %v608_v8  ;;  %612 = vst [vmem:[#allocation2 + $0x14] sm:$0x1] %v611_v9  ;;  %v623_v13 = vsel %vm2311_vm10, %v585_v2, %v622_v62  ;;  %v506_v30 = vmul.f32 0.01, %v504_v16  ;;  %v514_v63 = vunpack.c.l.bf16 %v513_v50  ;;  %s456_s18 = scalar_lea.vmem %s2586_s7, %s1840_s14 }
  0x2b   : > { %615 = vst [vmem:[#allocation2 + $0x18] sm:$0xf] %v614_v10  ;;  %618 = vst [vmem:[#allocation2 + $0x1c] sm:$0x1] %v617_v11  ;;  %v1226_v59 = vsel %vm749_vm0, %v2242_v3, 0 }
  0x2c   : > { %621 = vst [vmem:[#allocation2 + $0x20] sm:$0xf] %v620_v12  ;;  %624 = vst [vmem:[#allocation2 + $0x24] sm:$0x1] %v623_v13  ;;  %v507_v55 = vsel %vm505_vm13, %v504_v16, %v506_v30  ;;  %v515_v18 = vmul.f32 %v2267_v7, %v514_v63 }
  0x2d   : > { %v511_v4 = vsel %vm2339_vm14, %v507_v55, 0.0 }
  0x2e   : > { %v1919_v9 = vpack.c.bf16 %v511_v4, %v511_v4 }
  0x30   : > { %v1049_v19 = vld [vmem:[#allocation2 + $0x8] sm:$0xf]  ;;  %v2343_v20 = vld [vmem:[#allocation2 + $0xc] sm:$0x1]  ;;  %v630_v15 = vshrl.u32 %v1919_v9, 16  ;;  %v633_v16 = vshll.u32 %v1919_v9, 16 }
  0x31   : > { %v1051_v21 = vld [vmem:[#allocation2 + $0x10] sm:$0xf]  ;;  %v2345_v22 = vld [vmem:[#allocation2 + $0x14] sm:$0x1]  ;;  %v1058_v23 = vshrl.u32 %v1049_v19, 16  ;;  %v1061_v24 = vshll.u32 %v1049_v19, 16 }
  0x32   : > { %v1067_v25 = vshll.u32 %v2343_v20, 16  ;;  %v1072_v26 = vshrl.u32 %v1051_v21, 16  ;;  %v1075_v27 = vshll.u32 %v1051_v21, 16  ;;  %v1081_v28 = vshll.u32 %v2345_v22, 16  ;;  %v1053_v29 = vld [vmem:[#allocation2 + $0x18] sm:$0xf] }
  0x33   : > { %v1060_v31 = vrot.slane %v1058_v23, 4  ;;  %v1063_v32 = vrot.slane %v1061_v24, 5  ;;  %v2349_v35 = vld [vmem:[#allocation2 + $0x1c] sm:$0x1]  ;;  %v1055_v38 = vld [vmem:[#allocation2 + $0x20] sm:$0xf] }
  0x34   : > { %v1069_v33 = vrot.slane %v1067_v25, 5  ;;  %v1074_v34 = vrot.slane %v1072_v26, 4  ;;  %v1077_v36 = vrot.slane %v1075_v27, 5  ;;  %v1083_v37 = vrot.slane %v1081_v28, 5  ;;  %v2354_v39 = vld [vmem:[#allocation2 + $0x24] sm:$0x1] }
  0x35   : > { %v1064_v40 = vor.u32 %v1063_v32, %v1060_v31  ;;  %v1086_v41 = vshrl.u32 %v1053_v29, 16  ;;  %v1089_v42 = vshll.u32 %v1053_v29, 16  ;;  %v1095_v43 = vshll.u32 %v2349_v35, 16  ;;  %v2374_v3 = vld [vmem:[#allocation2 + $0x10] sm:$0xf] }
  0x36   : > { %v1078_v45 = vor.u32 %v1077_v36, %v1074_v34  ;;  %v1100_v46 = vshrl.u32 %v1055_v38, 16  ;;  %v1103_v47 = vshll.u32 %v1055_v38, 16  ;;  %v1109_v48 = vshll.u32 %v2354_v39, 16  ;;  %v2377_v12 = vld [vmem:[#allocation2 + $0x8] sm:$0xf] }
  0x37   : > { %v1065_v52 = vrot.slane %v1064_v40, 4  ;;  %v1088_v53 = vrot.slane %v1086_v41, 4  ;;  %v1091_v54 = vrot.slane %v1089_v42, 5  ;;  %v1097_v62 = vrot.slane %v1095_v43, 5  ;;  %v2382_v17 = vld [vmem:[#allocation2 + $0x18] sm:$0xf] }
  0x38   : > { %v1079_v56 = vrot.slane %v1078_v45, 4  ;;  %v1102_v57 = vrot.slane %v1100_v46, 4  ;;  %v1105_v58 = vrot.slane %v1103_v47, 5  ;;  %v1111_v2 = vrot.slane %v1109_v48, 5  ;;  %v639_v21 = vld [vmem:[#allocation2] sm:$0xf] }
  0x39   : > { %v1070_v60 = vsel %vm2359_vm2, %v1065_v52, %v1069_v33  ;;  %v1092_v61 = vor.u32 %v1091_v54, %v1088_v53  ;;  %v1197_v10 = vrot.slane %v2343_v20, 5  ;;  %v1201_v19 = vrot.slane %v2345_v22, 5  ;;  %v642_v23 = vld [vmem:[#allocation2 + $0x4] sm:$0x1]  ;;  %v1886_v26 = vld [vmem:[%s2584_s5 + $0x18] sm:$0xf] }
  0x3a   : > { %v1084_v0 = vsel %vm2359_vm2, %v1079_v56, %v1083_v37  ;;  %v1106_v1 = vor.u32 %v1105_v58, %v1102_v57  ;;  %v707_v24 = vshrl.u32 %v2374_v3, 16  ;;  %v710_v25 = vshll.u32 %v2374_v3, 16  ;;  %v2397_v28 = vld [vmem:[#allocation2 + $0xc] sm:$0x1]  ;;  %v2401_v30 = vld [vmem:[#allocation2 + $0x14] sm:$0x1] }
  0x3b   : > { %v1873_v6 = vcombine.low %v1070_v60, %v1084_v0  ;;  %v1093_v8 = vrot.slane %v1092_v61, 4  ;;  %v632_v7 = vrot.slane %v630_v15, 7  ;;  %v693_v22 = vshrl.u32 %v2377_v12, 16  ;;  %v1183_v40 = vld [vmem:[#allocation2 + $0x8] sm:$0xe] }
  0x3c   : > { %v1107_v11 = vrot.slane %v1106_v1, 4  ;;  %v696_v29 = vshll.u32 %v2377_v12, 16  ;;  %v709_v31 = vrot.slane %v707_v24, 4  ;;  %v712_v32 = vrot.slane %v710_v25, 5  ;;  %v1184_v41 = vld [vmem:[#allocation2 + $0x10] sm:$0xe] }
  0x3d   : > { %1983 = vmatprep.mubr.msk.bf16.mxu0 %vm742_vm15, %v1873_v6  ;;  %v1098_v13 = vsel %vm2359_vm2, %v1093_v8, %v1097_v62  ;;  %v721_v33 = vshrl.u32 %v2382_v17, 16  ;;  %v724_v34 = vshll.u32 %v2382_v17, 16  ;;  %v1205_v36 = vrot.slane %v2349_v35, 5  ;;  %v1185_v45 = vld [vmem:[#allocation2 + $0x18] sm:$0xe] }
  0x3e   : > { %v1112_v20 = vsel %vm2359_vm2, %v1107_v11, %v1111_v2  ;;  %v635_v37 = vor.u32 %v633_v16, %v632_v7  ;;  %v636_v38 = vrot.slane %v632_v7, 4  ;;  %v1186_v46 = vld [vmem:[#allocation2 + $0x20] sm:$0xe]  ;;  %v516_v47 = vadd.f32 %v2274_v14, %v515_v18  ;;  %v2414_v54 = vld [vmem:[#allocation2 + $0x1c] sm:$0x1] }
  0x3f   : > { %v1874_v27 = vcombine.low %v1098_v13, %v1112_v20  ;;  %v723_v42 = vrot.slane %v721_v33, 4  ;;  %v726_v43 = vrot.slane %v724_v34, 5  ;;  %v521_v48 = vstv %s2395_s17  ;;  %v1360_v8 = vld [vmem:[#allocation2 + $0x10] sm:$0xf]  ;;  %v2449_v34 = vld [vmem:[#allocation2 + $0x14] sm:$0x1] }
  0x40   : > { %v1209_v50 = vrot.slane %v2354_v39, 5  ;;  %v640_v52 = vsel %vm2299_vm9, %v635_v37, %v639_v21  ;;  %v643_v35 = vsel %vm2311_vm10, %v636_v38, %v642_v23  ;;  %v695_v53 = vrot.slane %v693_v22, 4  ;;  %v2439_v23 = vld [vmem:[%s2584_s5 + $0x1c] sm:$0xf]  ;;  %v1362_v38 = vld [vmem:[#allocation2 + $0x18] sm:$0xf] }
  0x41   : > { %1984 = vmatmul.mubr.msk.bf16.vlgmr.msra.gmra.mrb[0].mxu0 %vm742_vm15, %v1874_v27  ;;  %641 = vst [vmem:[#allocation2] sm:$0xf] %v640_v52  ;;  %644 = vst [vmem:[#allocation2 + $0x4] sm:$0x1] %v643_v35  ;;  %v698_v55 = vrot.slane %v696_v29, 5  ;;  %v702_v56 = vshll.u32 %v2397_v28, 16  ;;  %v713_v14 = vor.u32 %v712_v32, %v709_v31  ;;  %v727_v62 = vor.u32 %v726_v43, %v723_v42 }
  0x42   : > { %1988 = vmatpush3.bf16.msra.mxu0 %v1226_v59  ;;  %v716_v57 = vshll.u32 %v2401_v30, 16  ;;  %v1877_v58 = vrot.slane %v1183_v40, 9  ;;  %v1878_v59 = vrot.slane %v1184_v41, 9  ;;  %v1879_v60 = vrot.slane %v1185_v45, 9  ;;  %v2457_v43 = vld [vmem:[#allocation2 + $0x1c] sm:$0x1] }
  0x43   : > { %2049 = vmatprep.subr.msk.bf16.mxu0 %vm749_vm0, %v1886_v26  ;;  %v1880_v61 = vrot.slane %v1186_v46, 9  ;;  %v730_v63 = vshll.u32 %v2414_v54, 16  ;;  %v1305_v0 = vsel %vm749_vm0, %v1886_v26, 0  ;;  %vm517_vm6 = vcmp.gt.f32.partialorder %v516_v47, 0.0 }
  0x44   : > { %v1198_v1 = vsel %vm2421_vm5, %v1877_v58, %v1197_v10  ;;  %v1202_v2 = vsel %vm2421_vm5, %v1878_v59, %v1201_v19  ;;  %v1206_v4 = vsel %vm2421_vm5, %v1879_v60, %v1205_v36  ;;  %v699_v9 = vor.u32 %v698_v55, %v695_v53  ;;  %v2095_v19 = vld [vmem:[#allocation2 + $0x10] ss:$8 sps:$4 sm:$0xff]   ;;  %v1364_v59 = vld [vmem:[#allocation2 + $0x20] sm:$0xf] }
  0x45   : > { %v1210_v6 = vsel %vm2421_vm5, %v1880_v61, %v1209_v50  ;;  %v1882_v11 = vcombine.low %v1198_v1, %v1202_v2  ;;  %v518_v13 = vmul.f32 0.01, %v516_v47  ;;  %vm522_vm7 = vcmp.eq.s32.totalorder %v521_v48, 1 }
  0x46   : > { %v704_v15 = vrot.slane %v702_v56, 5  ;;  %v714_v16 = vrot.slane %v713_v14, 4  ;;  %v718_v18 = vrot.slane %v716_v57, 5  ;;  %v1883_v20 = vcombine.low %v1206_v4, %v1210_v6 }
  0x47   : > { %v728_v21 = vrot.slane %v727_v62, 4  ;;  %v732_v10 = vrot.slane %v730_v63, 5  ;;  %1989 = vmatprep.mubr.msk.bf16.mxu0 %vm742_vm15, %v1882_v11  ;;  %v519_v24 = vsel %vm517_vm6, %v516_v47, %v518_v13  ;;  %v1369_v25 = vshrl.u32 %v1360_v8, 16  ;;  %v660_v63 = vld [vmem:[#allocation2 + $0x28] sm:$0xf] }
  0x48   : > { %v2442_v26 = vld [vmem:[#allocation2] sm:$0xf]  ;;  %v2444_v27 = vld [vmem:[#allocation2 + $0x4] sm:$0x1]  ;;  %v523_v7 = vsel %vm522_vm7, %v519_v24, 0.0  ;;  %v1372_v22 = vshll.u32 %v1360_v8, 16  ;;  %v719_v36 = vsel %vm2359_vm2, %v714_v16, %v718_v18 }
  0x49   : > { %v679_v29 = vshrl.u32 %v2442_v26, 16  ;;  %v682_v31 = vshll.u32 %v2442_v26, 16  ;;  %v688_v32 = vshll.u32 %v2444_v27, 16  ;;  %v700_v33 = vrot.slane %v699_v9, 4  ;;  %v663_v8 = vld [vmem:[#allocation2 + $0x2c] sm:$0x1] }
  0x4a   : > { %v1920_v37 = vpack.c.bf16 %v523_v7, %v523_v7  ;;  %v733_v42 = vsel %vm2359_vm2, %v728_v21, %v732_v10  ;;  %v1371_v45 = vrot.slane %v1369_v25, 4  ;;  %v1374_v48 = vrot.slane %v1372_v22, 5  ;;  %v871_v11 = vld [vmem:[#allocation2 + $0x8] sm:$0xe]  ;;  %v870_v21 = vld [vmem:[#allocation2] sm:$0xe] }
  0x4b   : > { %v681_v40 = vrot.slane %v679_v29, 4  ;;  %v684_v41 = vrot.slane %v682_v31, 5  ;;  %v1378_v50 = vshll.u32 %v2449_v34, 16  ;;  %v690_v35 = vrot.slane %v688_v32, 5  ;;  %v2487_v32 = vld [vmem:[#allocation2 + $0x24] sm:$0x1] }
  0x4c   : > { %v650_v46 = vshrl.u32 %v1920_v37, 16  ;;  %v653_v47 = vshll.u32 %v1920_v37, 16  ;;  %v705_v53 = vsel %vm2359_vm2, %v700_v33, %v704_v15  ;;  %v1383_v55 = vshrl.u32 %v1362_v38, 16 }
  0x4d   : > { %1990 = vmatmul.mubr.msk.bf16.vlgmr.msra.gmra.mrb[0].mxu0 %vm742_vm15, %v1883_v20  ;;  %v685_v52 = vor.u32 %v684_v41, %v681_v40  ;;  %v1375_v14 = vor.u32 %v1374_v48, %v1371_v45  ;;  %v1386_v57 = vshll.u32 %v1362_v38, 16  ;;  %v1392_v58 = vshll.u32 %v2457_v43, 16  ;;  %v1900_v38 = vld [vmem:[%s2584_s5 + $0x20] sm:$0xf] }
  0x4e   : > { %1994 = vmatpush3.bf16.msra.mxu0 %v1305_v0  ;;  %1995 = vmatprep.mubr.msk.bf16.mxu0 %vm742_vm15, %v2095_v19  ;;  %v652_v56 = vrot.slane %v650_v46, 7  ;;  %v1851_v61 = vcombine.low %v719_v36, %v733_v42  ;;  %v1854_v62 = vcombine.low %v2442_v26, %v2377_v12  ;;  %v1385_v0 = vrot.slane %v1383_v55, 4  ;;  %v1862_v26 = vld [vmem:[%s2584_s5 + $0x8] sm:$0xf]  ;;  %v1494_v42 = vld [vmem:[#allocation2 + $0x10] sm:$0xe] }
  0x4f   : > { %2050 = vmatprep.subr.msk.bf16.mxu0 %vm749_vm0, %v2439_v23  ;;  %v686_v60 = vrot.slane %v685_v52, 4  ;;  %v1380_v4 = vrot.slane %v1378_v50, 5  ;;  %v1388_v6 = vrot.slane %v1386_v57, 5  ;;  %v1376_v13 = vrot.slane %v1375_v14, 4  ;;  %v1495_v50 = vld [vmem:[#allocation2 + $0x18] sm:$0xe] }
  0x50   : > { %v655_v1 = vor.u32 %v653_v47, %v652_v56  ;;  %v656_v2 = vrot.slane %v652_v56, 4  ;;  %v1397_v15 = vshrl.u32 %v1364_v59, 16  ;;  %v1400_v16 = vshll.u32 %v1364_v59, 16  ;;  %v872_v55 = vld [vmem:[#allocation2 + $0x10] sm:$0xe] }
  0x51   : > { %v691_v9 = vsel %vm2359_vm2, %v686_v60, %v690_v35  ;;  %v1389_v12 = vor.u32 %v1388_v6, %v1385_v0  ;;  %v1394_v10 = vrot.slane %v1392_v58, 5  ;;  %v819_v19 = vsel %vm749_vm0, %v2254_v5, 0  ;;  %v873_v59 = vld [vmem:[#allocation2 + $0x18] sm:$0xe] }
  0x52   : > { %v1850_v18 = vcombine.low %v691_v9, %v705_v53  ;;  %v661_v20 = vsel %vm2299_vm9, %v655_v1, %v660_v63  ;;  %v664_v24 = vsel %vm2311_vm10, %v656_v2, %v663_v8  ;;  %v891_v25 = vrot.slane %v2397_v28, 5 }
  0x53   : > { %662 = vst [vmem:[#allocation2 + $0x28] sm:$0xf] %v661_v20  ;;  %v1859_v49 = vrot.slane %v871_v11, 9  ;;  %v1390_v7 = vrot.slane %v1389_v12, 4  ;;  %665 = vst [vmem:[#allocation2 + $0x2c] sm:$0x1] %v664_v24  ;;  %v1381_v51 = vsel %vm2359_vm2, %v1376_v13, %v1380_v4  ;;  %v1855_v52 = vcombine.low %v2374_v3, %v2382_v17 }
  0x54   : > { %1959 = vmatprep.mubr.msk.bf16.mxu1 %vm742_vm15, %v1850_v18  ;;  %v887_v22 = vrot.slane %v2444_v27, 5  ;;  %v1858_v5 = vrot.slane %v870_v21, 9  ;;  %v1399_v29 = vrot.slane %v1397_v15, 4  ;;  %v1402_v31 = vrot.slane %v1400_v16, 5  ;;  %v1867_v4 = vld [vmem:[%s2584_s5 + $0xc] sm:$0xf] }
  0x55   : > { %1960 = vmatmul.mubr.msk.bf16.vlgmr.msra.gmra.mrb[0].mxu1 %vm742_vm15, %v1851_v61  ;;  %v1395_v28 = vsel %vm2359_vm2, %v1390_v7, %v1394_v10  ;;  %v1439_v27 = vsel %vm749_vm0, %v2439_v23, 0  ;;  %v892_v33 = vsel %vm2421_vm5, %v1859_v49, %v891_v25  ;;  %v1406_v41 = vshll.u32 %v2487_v32, 16  ;;  %v1496_v20 = vld [vmem:[#allocation2 + $0x20] sm:$0xe]  ;;  %v2097_v25 = vld [vmem:[#allocation2 + $0x8] ss:$8 sps:$4 sm:$0xff]  }
  0x56   : > { %1964 = vmatpush3.bf16.msra.mxu1 %v819_v19  ;;  %1965 = vmatprep.mubr.msk.bf16.mxu1 %vm742_vm15, %v1854_v62  ;;  %v888_v36 = vsel %vm2421_vm5, %v1858_v5, %v887_v22  ;;  %v1892_v37 = vcombine.low %v1381_v51, %v1395_v28  ;;  %v1403_v40 = vor.u32 %v1402_v31, %v1399_v29  ;;  %v1896_v60 = vrot.slane %v1494_v42, 9  ;;  %v2098_v5 = vld [vmem:[#allocation2 + $0x18] ss:$8 sps:$4 sm:$0xff]  }
  0x57   : > { %2045 = vmatprep.subr.msk.bf16.mxu1 %vm749_vm0, %v1862_v26  ;;  %v1863_v35 = vcombine.low %v888_v36, %v892_v33  ;;  %v1408_v14 = vrot.slane %v1406_v41, 5  ;;  %v1508_v61 = vrot.slane %v2449_v34, 5  ;;  %v1897_v62 = vrot.slane %v1495_v50, 9 }
  0x58   : > { %v1404_v56 = vrot.slane %v1403_v40, 4  ;;  %v1512_v3 = vrot.slane %v2457_v43, 5  ;;  %v916_v17 = vsel %vm749_vm0, %v1862_v26, 0  ;;  %v895_v1 = vrot.slane %v2401_v30, 5 }
  0x59   : > { %v899_v2 = vrot.slane %v2414_v54, 5  ;;  %v1860_v6 = vrot.slane %v872_v55, 9  ;;  %v1861_v8 = vrot.slane %v873_v59, 9  ;;  %v1509_v30 = vsel %vm2421_vm5, %v1896_v60, %v1508_v61 }
  0x5a   : > { %v2096_v45 = vld [vmem:[#allocation2 + $0x20] ss:$8 sps:$4 sm:$0xff]   ;;  %v1367_v47 = vld [vmem:[#allocation2 + $0x2c] sm:$0x1]  ;;  %v1409_v34 = vsel %vm2359_vm2, %v1404_v56, %v1408_v14  ;;  %v1513_v54 = vsel %vm2421_vm5, %v1897_v62, %v1512_v3  ;;  %v1537_v18 = vsel %vm749_vm0, %v1900_v38, 0  ;;  %v1898_v44 = vrot.slane %v1496_v20, 9 }
  0x5b   : > { %v1366_v46 = vld [vmem:[#allocation2 + $0x28] sm:$0xf]  ;;  %1996 = vmatmul.mubr.msk.bf16.vlgmr.msra.gmra.mrb[0].mxu0 %vm742_vm15, %v2096_v45  ;;  %v1420_v53 = vshll.u32 %v1367_v47, 16  ;;  %v896_v13 = vsel %vm2421_vm5, %v1860_v6, %v895_v1  ;;  %v900_v15 = vsel %vm2421_vm5, %v1861_v8, %v899_v2  ;;  %v1901_v16 = vcombine.low %v1509_v30, %v1513_v54 }
  0x5c   : > { %v1411_v48 = vshrl.u32 %v1366_v46, 16  ;;  %v1414_v23 = vshll.u32 %v1366_v46, 16  ;;  %2000 = vmatpush3.bf16.msra.mxu0 %v1439_v27  ;;  %2001 = vmatprep.mubr.msk.bf16.mxu0 %vm742_vm15, %v1892_v37  ;;  %v1497_v21 = vld [vmem:[#allocation2 + $0x28] sm:$0xe]  ;;  %v1864_v12 = vcombine.low %v896_v13, %v900_v15  ;;  %v1516_v10 = vrot.slane %v2487_v32, 5 }
  0x5d   : > { %2051 = vmatprep.subr.msk.bf16.mxu0 %vm749_vm0, %v1900_v38  ;;  %v1422_v0 = vrot.slane %v1420_v53, 5  ;;  %v1899_v19 = vrot.slane %v1497_v21, 9  ;;  %v1520_v24 = vrot.slane %v1367_v47, 5  ;;  %v994_v26 = vsel %vm749_vm0, %v1867_v4, 0 }
  0x5e   : > { %v1413_v57 = vrot.slane %v1411_v48, 4  ;;  %v1416_v58 = vrot.slane %v1414_v23, 5  ;;  %v1517_v49 = vsel %vm2421_vm5, %v1898_v44, %v1516_v10 }
  0x5f   : > { %v1521_v7 = vsel %vm2421_vm5, %v1899_v19, %v1520_v24 }
  0x60   : > { %v1417_v63 = vor.u32 %v1416_v58, %v1413_v57  ;;  %v1902_v22 = vcombine.low %v1517_v49, %v1521_v7 }
  0x61   : > { %1966 = vmatmul.mubr.msk.bf16.vlgmr.msra.gmra.mrb[0].mxu1 %vm742_vm15, %v1855_v52 }
  0x62   : > { %v1418_v43 = vrot.slane %v1417_v63, 4  ;;  %1970 = vmatpush3.bf16.msra.mxu1 %v916_v17  ;;  %1971 = vmatprep.mubr.msk.bf16.mxu1 %vm742_vm15, %v1863_v35 }
  0x63   : > { %2046 = vmatprep.subr.msk.bf16.mxu1 %vm749_vm0, %v1867_v4  ;;  %vm1630_vm0 = vcmask 1040384  }
  0x64   : > { %v1423_v9 = vsel %vm2359_vm2, %v1418_v43, %v1422_v0 }
  0x65   : > { %v1893_v11 = vcombine.low %v1409_v34, %v1423_v9 }
  0x67   : > { %2002 = vmatmul.mubr.msk.bf16.vlgmr.msra.gmra.mrb[0].mxu0 %vm742_vm15, %v1893_v11 }
  0x68   : > { %2006 = vmatpush3.bf16.msra.mxu0 %v1537_v18  ;;  %2007 = vmatprep.mubr.msk.bf16.mxu0 %vm742_vm15, %v1901_v16 }
  0x6d   : > { %1972 = vmatmul.mubr.msk.bf16.vlgmr.msra.gmra.mrb[0].mxu1 %vm742_vm15, %v1864_v12 }
  0x6e   : > { %1976 = vmatpush3.bf16.msra.mxu1 %v994_v26  ;;  %1977 = vmatprep.mubr.msk.bf16.mxu1 %vm742_vm15, %v2097_v25 }
  0x73   : > { %2008 = vmatmul.mubr.msk.bf16.vlgmr.msra.gmra.mrb[0].mxu0 %vm742_vm15, %v1902_v22 }
  0x79   : > { %1978 = vmatmul.mubr.msk.bf16.vlgmr.msra.gmra.mrb[0].mxu1 %vm742_vm15, %v2098_v5 }
 0x146   : > { %v2009_v29 = vpop.f32.mrb[0].mxu0 }
 0x147   : > { %v1573_v31 = vpop.f32.mrb[1].mxu0 }
 0x148   : > { %v2010_v51 = vpop.f32.mrb[2].mxu0 }
 0x149   : > { %v1576_v28 = vpop.f32.mrb[3].mxu0 }
 0x14c   : > { %v1979_v32 = vpop.f32.mrb[0].mxu1 }
 0x14d   : > { %v1030_v27 = vpop.f32.mrb[1].mxu1  ;;  %v2011_v33 = vadd.f32 %v2009_v29, %v1979_v32 }
 0x14e   : > { %v1980_v36 = vpop.f32.mrb[2].mxu1  ;;  %v2012_v39 = vadd.f32 %v1573_v31, %v1030_v27 }
 0x14f   : > { %v1033_v37 = vpop.f32.mrb[3].mxu1  ;;  %v1594_v38 = vpack.c.bf16 %v2011_v33, %v2011_v33  ;;  %v2013_v40 = vadd.f32 %v2010_v51, %v1980_v36  ;;  %v1615_v46 = vmul.f32 %v2011_v33, %v2011_v33  ;;  %v1603_v53 = vsel %vm742_vm15, %v2011_v33, 0.0 }
 0x150   : > { %v1592_v41 = vpack.c.bf16 %v2012_v39, %v2012_v39  ;;  %v1613_v42 = vmul.f32 %v2012_v39, %v2012_v39  ;;  %v2014_v45 = vadd.f32 %v1576_v28, %v1033_v37  ;;  %v1600_v48 = vsel %vm742_vm15, %v2012_v39, 0.0 }
 0x151   : > { %1598 = vst.msk [vmem:[%s447_s11 + $0x8] sm:$0xf] %vm524_vm1, %v1594_v38  ;;  %v1595_v47 = vpack.c.bf16 %v2013_v40, %v2013_v40  ;;  %v1616_v56 = vmul.f32 %v2013_v40, %v2013_v40  ;;  %v1620_v59 = vsel %vm742_vm15, %v1615_v46, 0.0  ;;  %v1605_v60 = vsel %vm742_vm15, %v2013_v40, 0.0 }
 0x152   : > { %1596 = vst.msk [vmem:[%s447_s11] sm:$0xf] %vm524_vm1, %v1592_v41  ;;  %v1593_v23 = vpack.c.bf16 %v2014_v45, %v2014_v45  ;;  %v1601_v50 = vsel %vm742_vm15, %v2014_v45, 0.0  ;;  %v1614_v52 = vmul.f32 %v2014_v45, %v2014_v45  ;;  %v1617_v55 = vsel %vm742_vm15, %v1613_v42, 0.0 }
 0x153   : > { %1599 = vst.msk [vmem:[%s447_s11 + $0xc] sm:$0xf] %vm524_vm1, %v1595_v47  ;;  %v1602_v35 = vadd.f32 %v1601_v50, %v1600_v48  ;;  %v1622_v3 = vsel %vm742_vm15, %v1616_v56, 0.0 }
 0x154   : > { %1597 = vst.msk [vmem:[%s447_s11 + $0x4] sm:$0xf] %vm524_vm1, %v1593_v23  ;;  %v1618_v14 = vsel %vm742_vm15, %v1614_v52, 0.0  ;;  %vm1632_vm1 = vcmask 58368  }
 0x155   : > { %v1604_v57 = vadd.f32 %v1603_v53, %v1602_v35  ;;  %v1619_v58 = vadd.f32 %v1618_v14, %v1617_v55 }
 0x157   : > { %v1606_v61 = vadd.f32 %v1605_v60, %v1604_v57  ;;  %v1621_v62 = vadd.f32 %v1620_v59, %v1619_v58 }
 0x159   : > { %v1607_v17 = vrot.slane %v1606_v61, 4  ;;  %v1623_v63 = vadd.f32 %v1622_v3, %v1621_v62 }
 0x15b   : > { %v1608_v0 = vadd.f32 %v1607_v17, %v1606_v61  ;;  %v1624_v1 = vrot.slane %v1623_v63, 4 }
 0x15d   : > { %v1609_v2 = vrot.slane %v1608_v0, 2  ;;  %v1625_v4 = vadd.f32 %v1624_v1, %v1623_v63 }
 0x15f   : > { %v1610_v6 = vadd.f32 %v1609_v2, %v1608_v0  ;;  %v1626_v8 = vrot.slane %v1625_v4, 2 }
 0x161   : > { %v1611_v34 = vrot.slane %v1610_v6, 1  ;;  %v1627_v43 = vadd.f32 %v1626_v8, %v1625_v4 }
 0x163   : > { %v1628_v30 = vrot.slane %v1627_v43, 1  ;;  %v1612_v54 = vadd.f32 %v1611_v34, %v1610_v6 }
 0x165   : > { %v1629_v9 = vadd.f32 %v1628_v30, %v1627_v43 }
 0x167   : > { %v1631_v11 = vsel %vm1630_vm0, %v1612_v54, %v1629_v9 }
 0x168   : > { %1633 = vst.msk [vmem:[%s456_s18] sm:$0x3] %vm1632_vm1, %v1631_v11 }
 0x169 PF: > { %s18_s28 = sadd.s32 1, %s2137_s28   ;;  %s2598_s24 = smov %s2129_s26 }
 0x16a   : > { %p15_p12 = scmp.ge.s32.totalorder %s18_s28, 6   ;;  %s2599_s25 = smov %s2133_s27 }
 0x16b   : > { %s2600_s26 = smov %s2603_s29  ;;  %s2601_s27 = smov %s2607_s30 }
 0x16c   :  { %17 = sbr.rel (!%p15_p12) target bundleno = 3 (0x3), region = 103 }

// kernel: _lambda_.2
= control target key start
LH: loop header
LB: loop body
LE: loop exit
PB: predicated region body
PF: predicated region fallthrough
CT: control target
= control target key end

     0   :  { %s2141_s18 = smov 0   ;;  %s2143_s19 = smov 0   ;;  %s2510_s0 = inlined_call_operand.vmem [shape: f32[2,8,2,8,8], index: 0, kind: input, shape index: {}, may-alias: {0,1,2}]   ;;  %s2511_s1 = inlined_call_operand.vmem [shape: f32[2,8,2,8,8], index: 1, kind: input, shape index: {}, may-alias: {0,1,2}]   ;;  %s2512_s2 = inlined_call_operand.vmem [shape: f32[2,8,2,8,8], index: 2, kind: input, shape index: {}, may-alias: {0,1,2}]   ;;  %s2513_s3 = inlined_call_operand.vmem [shape: bf16[9,4,8], index: 3, kind: input, shape index: {}]   ;;  %s2514_s4 = inlined_call_operand.vmem [shape: bf16[2,8,8,8], index: 4, kind: output, shape index: {0}]   ;;  %s2515_s5 = inlined_call_operand.vmem [shape: f32[2,2,2,8], index: 5, kind: output, shape index: {1}]  }
   0x1   :  { %s2145_s20 = smov 0   ;;  %s2147_s21 = smov 0  }
   0x2   :  { %s2149_s22 = smov 0  }
   0x3 LB: > { %s25_s23 = sadd.s32 1, %s2099_s20  ;;  %s28_s24 = sadd.s32 1, %s2103_s21  ;;  %s2107_s22 = sphi %s2149_s22, %s16_s22   ;;  %s2103_s21 = sphi %s2147_s21, %s2530_s21   ;;  %s2099_s20 = sphi %s2145_s20, %s2529_s20   ;;  %s2095_s19 = sphi %s2143_s19, %s2528_s19   ;;  %s2091_s18 = sphi %s2141_s18, %s2527_s18  }
   0x4   : > { %p26_p0 = scmp.ge.s32.totalorder %s25_s23, 2  ;;  %p1778_p1 = scmp.ge.s32.totalorder %s2107_s22, 1 }
   0x5   : > { %p278_p2 = scmp.lt.s32.totalorder %s2107_s22, 5 }
   0x6   : > { %s2532_s23 = smov (%p26_p0, %s25_s23), 0  ;;  %s2534_s24 = smov (!%p26_p0, %s28_s24), %s2103_s21 }
   0x7   : > { %p279_p3 = pnand %p1778_p1, %p278_p2  ;;  %p30_p4 = scmp.ge.s32.totalorder %s2534_s24, 2 }
   0x8   : > { %s2176_s25 = sshll.u32 (!%p279_p3), %s2091_s18, 2  ;;  %p350_p5 = scmp.lt.s32.totalorder (!%p279_p3), %s2095_s19, 1  ;;  %vm464_vm0 = vcmask (!%p279_p3), 27648   ;;  %vm466_vm1 = vcmask (!%p279_p3), 24576   ;;  %v2109_v0 = vmov (!%p279_p3), 0   ;;  %vm699_vm2 = vcmask (!%p279_p3), 1041408  }
   0x9   : > { %s2536_s24 = smov (%p30_p4, %s2534_s24), 0  ;;  %282 = sbr.rel (%p279_p3) target bundleno = 481 (0x1e1), region = 36 }
   0xa   : > { %p352_p6 = scmp.lt.s32.totalorder (!%p279_p3), %s2176_s25, 7  ;;  %468 = vst.msk [vmem:[#allocation2 + $0x8] sm:$0xf] (!%p279_p3), %vm464_vm0, %v2109_v0  ;;  %470 = vst.msk [vmem:[#allocation2 + $0x10] sm:$0xf] (!%p279_p3), %vm464_vm0, %v2109_v0  ;;  %s1784_s28 = sadd.s32 (!%p279_p3), 4294967295, %s2176_s25 }
   0xb   : > { %469 = vst.msk [vmem:[#allocation2 + $0xc] sm:$0x1] (!%p279_p3), %vm466_vm1, %v2109_v0  ;;  %471 = vst.msk [vmem:[#allocation2 + $0x14] sm:$0x1] (!%p279_p3), %vm466_vm1, %v2109_v0  ;;  %p362_p7 = scmp.gt.s32.totalorder (!%p279_p3), %s1784_s28, 0  ;;  %p1785_p8 = scmp.lt.s32.totalorder (!%p279_p3), %s1784_s28, 7 }
   0xc   : > { %465 = vst.msk [vmem:[#allocation2] sm:$0xf] (!%p279_p3), %vm464_vm0, %v2109_v0  ;;  %472 = vst.msk [vmem:[#allocation2 + $0x18] sm:$0xf] (!%p279_p3), %vm464_vm0, %v2109_v0  ;;  %s1882_s7 = sadd.s32 (!%p279_p3), 4, %s2176_s25  ;;  %s2110_s16 = smov (!%p279_p3), 124  }
   0xd   : > { %467 = vst.msk [vmem:[#allocation2 + $0x4] sm:$0x1] (!%p279_p3), %vm466_vm1, %v2109_v0  ;;  %473 = vst.msk [vmem:[#allocation2 + $0x1c] sm:$0x1] (!%p279_p3), %vm466_vm1, %v2109_v0  ;;  %p2212_p9 = scmp.lt.s32.totalorder (!%p279_p3), %s1882_s7, 7  ;;  %p565_p10 = scmp.gt.s32.totalorder (!%p279_p3), %s2091_s18, 0 }
   0xe   : > { %474 = vst.msk [vmem:[#allocation2 + $0x20] sm:$0xf] (!%p279_p3), %vm464_vm0, %v2109_v0  ;;  %476 = vst.msk [vmem:[#allocation2 + $0x28] sm:$0xf] (!%p279_p3), %vm464_vm0, %v2109_v0  ;;  %v1840_v21 = vld [vmem:[%s2513_s3 + $0x8] sm:$0x3] (!%p279_p3) }
   0xf   : > { %475 = vst.msk [vmem:[#allocation2 + $0x24] sm:$0x1] (!%p279_p3), %vm466_vm1, %v2109_v0  ;;  %477 = vst.msk [vmem:[#allocation2 + $0x2c] sm:$0x1] (!%p279_p3), %vm466_vm1, %v2109_v0  ;;  %v1817_v22 = vld [vmem:[%s2513_s3 + $0x2] sm:$0x3] (!%p279_p3)  ;;  %2006 = vmatprep.subr.msk.bf16.mxu0 (!%p279_p3), %vm699_vm2, %v1840_v21 }
  0x10   : > { %s2538_s19 = smov (!%p350_p5, %s2095_s19), 1  ;;  %s2540_s7 = smov (!%p2212_p9, %s1882_s7), 7  ;;  %2002 = vmatprep.subr.msk.bf16.mxu1 %vm699_vm2, %v1817_v22  ;;  %v1078_v23 = vsel %vm699_vm2, %v1840_v21, 0  ;;  %v701_v24 = vsel %vm699_vm2, %v1817_v22, 0  ;;  %v2248_v25 = vld [vmem:[%s2513_s3 + $0xa] sm:$0x3] }
  0x11   : > { %s2200_s26 = scalar_select %p352_p6, %s2176_s25, 7  ;;  %1941 = vmatpush3.bf16.msra.mxu0 %v1078_v23  ;;  %1917 = vmatpush3.bf16.msra.mxu1 %v701_v24  ;;  %v2255_v26 = vld [vmem:[%s2513_s3] sm:$0x3]  ;;  %vm536_vm3 = vsmask.f32 7938  ;;  %vm692_vm12 = vcmask 31744  }
  0x12   : > { %s2203_s27 = sshll.u32 %s2538_s19, 4  ;;  %s2544_s7 = smov (!%p2212_p9, %s2540_s7), 7  ;;  %2007 = vmatprep.subr.msk.bf16.mxu0 %vm699_vm2, %v2248_v25  ;;  %2003 = vmatprep.subr.msk.bf16.mxu1 %vm699_vm2, %v2255_v26  ;;  %vm542_vm5 = vsmask.f32 256  ;;  %vm2267_vm6 = vmand %vm464_vm0, %vm536_vm3  ;;  %v538_v48 = vld [vmem:[#allocation2 + $0x8] sm:$0xf] }
  0x13   : > { %s1780_s29 = sshll.u32 %s2200_s26, 1  ;;  %s1797_s15 = sshll.u32 %s2544_s7, 1  ;;  %vm2273_vm7 = vmand %vm466_vm1, %vm542_vm5  ;;  %v544_v55 = vld [vmem:[#allocation2 + $0xc] sm:$0x1]  ;;  %v547_v56 = vld [vmem:[#allocation2 + $0x10] sm:$0xf] }
  0x14   : > { %s356_s30 = sadd.s32 %s2203_s27, %s1780_s29  ;;  %s387_s25 = sadd.s32 %s1797_s15, %s2203_s27  ;;  %v550_v57 = vld [vmem:[#allocation2 + $0x14] sm:$0x1]  ;;  %vm625_vm9 = vsmask.f32 3328  ;;  %vm626_vm10 = vsmask.f32 7440 }
  0x15   : > { %s1782_s6 = sshll.u32 %s356_s30, 3  ;;  %p406_p11 = scmp.lt.s32.totalorder %s2091_s18, 1  ;;  %vm2331_vm11 = vmor %vm625_vm9, %vm626_vm10  ;;  %vm832_vm13 = vcmask 1042432   ;;  %vm833_vm14 = vcmask 1046532   ;;  %vm1546_vm0 = vcmask 60416   ;;  %vm1551_vm1 = vcmask 64512  }
  0x16   : > { %s358_s10 = scalar_lea.vmem %s2510_s0, %s1782_s6  ;;  %s1799_s6 = sshll.u32 %s387_s25, 3  ;;  %vm2374_vm15 = vmor %vm832_vm13, %vm833_vm14  ;;  %vm1584_vm3 = vcmask 58368  }
  0x17   : > { %v413_v1 = vld [vmem:[%s358_s10] sm:$0xff]  ;;  %v414_v2 = vld [vmem:[%s358_s10 + $0x10] sm:$0xff]  ;;  %v1805_v3 = vld [vmem:[%s358_s10 + $0x8] sm:$0xff]  ;;  %s363_s12 = scalar_select %p362_p7, %s1784_s28, 0 }
  0x18   : > { %v1806_v4 = vld [vmem:[%s358_s10 + $0x18] sm:$0xff]  ;;  %v422_v5 = vmax.f32 %v413_v1, %v1805_v3  ;;  %v415_v6 = vld [vmem:[%s358_s10 + $0x20] sm:$0xff]  ;;  %v416_v7 = vld [vmem:[%s358_s10 + $0x30] sm:$0xff]  ;;  %s2263_s25 = scalar_select %p406_p11, 1, 0 }
  0x19   : > { %v423_v8 = vmax.f32 %v414_v2, %v1806_v4  ;;  %s2542_s12 = smov (!%p1785_p8, %s363_s12), 7  ;;  %v1807_v9 = vld [vmem:[%s358_s10 + $0x28] sm:$0xff]  ;;  %v1808_v10 = vld [vmem:[%s358_s10 + $0x38] sm:$0xff]  ;;  %s389_s10 = scalar_lea.vmem %s2512_s2, %s1799_s6 }
  0x1a   : > { %v2219_v11 = vmax.f32 %v415_v6, %v1807_v9  ;;  %v425_v12 = vmax.f32 %v416_v7, %v1808_v10  ;;  %s1790_s13 = sshll.u32 %s2542_s12, 1  ;;  %v455_v18 = vld [vmem:[%s389_s10] sm:$0xff]  ;;  %v1810_v19 = vld [vmem:[%s389_s10 + $0x8] sm:$0xff]  ;;  %v592_v42 = vstv %s2263_s25  ;;  %s1801_s12 = sshll.u32 %s2538_s19, 3 }
  0x1b   : > { %v2053_v13 = vpack.i.bf16 %v423_v8, %v422_v5  ;;  %s370_s14 = sadd.s32 %s1790_s13, %s2203_s27  ;;  %v2232_v20 = vmax.f32 %v455_v18, %v1810_v19  ;;  %vm2278_vm8 = vcmp.eq.s32.totalorder %v592_v42, 1  ;;  %v584_v9 = vld [vmem:[#allocation2] sm:$0xf]  ;;  %v587_v10 = vld [vmem:[#allocation2 + $0x4] sm:$0x1]  ;;  %s400_s13 = sadd.s32 %s1801_s12, %s2200_s26 }
  0x1c   : > { %s1792_s17 = sshll.u32 %s370_s14, 3  ;;  %v2058_v14 = vpack.i.bf16 %v425_v12, %v2219_v11  ;;  %s1802_s14 = sshll.u32 %s400_s13, 2 }
  0x1d   : > { %2054 = vrot.lane.b32.xlu0 %v2053_v13, %s2110_s16  ;;  %s372_s30 = scalar_lea.vmem %s2511_s1, %s1792_s17  ;;  %s2546_s18 = smov (!%p406_p11, %s2091_s18), 1 }
  0x1e   : > { %v446_v15 = vld [vmem:[%s372_s30] sm:$0xff]  ;;  %v1809_v16 = vld [vmem:[%s372_s30 + $0x8] sm:$0xff]  ;;  %s566_s17 = scalar_select %p565_p10, 1, 0 }
  0x1f   : > { %v449_v17 = vmax.f32 %v446_v15, %v1809_v16  ;;  %v559_v15 = vld [vmem:[#allocation2 + $0x20] sm:$0xf]  ;;  %v562_v16 = vld [vmem:[#allocation2 + $0x24] sm:$0x1]  ;;  %s1803_s26 = sshll.u32 %s2538_s19, 1 }
  0x20   : > { %v567_v30 = vstv %s566_s17  ;;  %s402_s17 = scalar_lea.vmem %s2514_s4, %s1802_s14  ;;  %s409_s25 = sadd.s32 %s1803_s26, %s2546_s18 }
  0x21   : > { %2059 = vrot.lane.b32.xlu0 %v2058_v14, %s2110_s16  ;;  %451 = vrot.lane.b32.xlu1 %v449_v17, %s2110_s16  ;;  %vm568_vm4 = vcmp.eq.s32.totalorder %v567_v30, 1  ;;  %v556_v30 = vld [vmem:[#allocation2 + $0x1c] sm:$0x1]  ;;  %s1804_s29 = sshll.u32 %s409_s25, 1 }
  0x22   : > { %s411_s6 = scalar_lea.vmem %s2515_s5, %s1804_s29 }
  0x25   : > { %460 = vrot.lane.b32.xlu1 %v2232_v20, %s2110_s16 }
  0x8f   : > { %v2055_v27 = vpop.permute.xlu0 %2054 }
  0x90   : > { %v2057_v28 = vunpack.i.h.bf16 %v2055_v27  ;;  %v2056_v29 = vunpack.i.l.bf16 %v2055_v27 }
  0x92   : > { %v443_v31 = vmax.f32 %v423_v8, %v2057_v28  ;;  %v442_v32 = vmax.f32 %v422_v5, %v2056_v29  ;;  %v553_v29 = vld [vmem:[#allocation2 + $0x18] sm:$0xf] }
  0x93   : > { %v2060_v33 = vpop.permute.xlu0 %2059  ;;  %v452_v36 = vpop.permute.xlu1 %451 }
  0x94   : > { %v1884_v34 = vpack.c.bf16 %v443_v31, %v443_v31  ;;  %v1883_v35 = vpack.c.bf16 %v442_v32, %v442_v32  ;;  %v2062_v37 = vunpack.i.h.bf16 %v2060_v33  ;;  %v2061_v38 = vunpack.i.l.bf16 %v2060_v33 }
  0x95   : > { %v454_v39 = vmax.f32 %v449_v17, %v452_v36 }
  0x96   : > { %v503_v40 = vshrl.u32 %v1884_v34, 16  ;;  %v495_v41 = vshrl.u32 %v1883_v35, 16  ;;  %v506_v44 = vshll.u32 %v1884_v34, 16  ;;  %v445_v46 = vmax.f32 %v425_v12, %v2062_v37  ;;  %v610_v37 = vld [vmem:[#allocation2 + $0x28] sm:$0xf] }
  0x97   : > { %v569_v45 = vsel %vm568_vm4, %v454_v39, 0.0  ;;  %v444_v47 = vmax.f32 %v2219_v11, %v2061_v38  ;;  %v498_v52 = vshll.u32 %v1883_v35, 16  ;;  %v461_v54 = vpop.permute.xlu1 %460 }
  0x98   : > { %v505_v50 = vrot.slane %v503_v40, 7  ;;  %v497_v51 = vrot.slane %v495_v41, 7  ;;  %v1887_v53 = vpack.c.bf16 %v569_v45, %v569_v45  ;;  %v1886_v58 = vpack.c.bf16 %v445_v46, %v445_v46  ;;  %v613_v40 = vld [vmem:[#allocation2 + $0x2c] sm:$0x1] }
  0x99   : > { %v1885_v59 = vpack.c.bf16 %v444_v47, %v444_v47  ;;  %v463_v60 = vmax.f32 %v2232_v20, %v461_v54 }
  0x9a   : > { %v508_v61 = vor.u32 %v506_v44, %v505_v50  ;;  %v509_v62 = vrot.slane %v505_v50, 4  ;;  %v500_v63 = vor.u32 %v498_v52, %v497_v51  ;;  %v501_v0 = vrot.slane %v497_v51, 4 }
  0x9b   : > { %v575_v1 = vshrl.u32 %v1887_v53, 16  ;;  %v578_v2 = vshll.u32 %v1887_v53, 16  ;;  %v519_v3 = vshrl.u32 %v1886_v58, 16  ;;  %v522_v13 = vshll.u32 %v1886_v58, 16 }
  0x9c   : > { %v548_v5 = vsel %vm2267_vm6, %v508_v61, %v547_v56  ;;  %v551_v6 = vsel %vm2273_vm7, %v509_v62, %v550_v57  ;;  %v539_v7 = vsel %vm2267_vm6, %v500_v63, %v538_v48  ;;  %v545_v8 = vsel %vm2273_vm7, %v501_v0, %v544_v55 }
  0x9d   : > { %549 = vst [vmem:[#allocation2 + $0x10] sm:$0xf] %v548_v5  ;;  %552 = vst [vmem:[#allocation2 + $0x14] sm:$0x1] %v551_v6  ;;  %v577_v11 = vrot.slane %v575_v1, 7  ;;  %v521_v12 = vrot.slane %v519_v3, 7 }
  0x9e   : > { %540 = vst [vmem:[#allocation2 + $0x8] sm:$0xf] %v539_v7  ;;  %546 = vst [vmem:[#allocation2 + $0xc] sm:$0x1] %v545_v8  ;;  %v511_v14 = vshrl.u32 %v1885_v59, 16  ;;  %v594_v17 = vsel %vm2278_vm8, %v463_v60, 0.0 }
  0x9f   : > { %v580_v18 = vor.u32 %v578_v2, %v577_v11  ;;  %v581_v19 = vrot.slane %v577_v11, 4  ;;  %v524_v20 = vor.u32 %v522_v13, %v521_v12  ;;  %v525_v21 = vrot.slane %v521_v12, 4 }
  0xa0   : > { %v513_v22 = vrot.slane %v511_v14, 7  ;;  %v514_v23 = vshll.u32 %v1885_v59, 16  ;;  %v1888_v24 = vpack.c.bf16 %v594_v17, %v594_v17 }
  0xa1   : > { %v585_v27 = vsel %vm2267_vm6, %v580_v18, %v584_v9  ;;  %v588_v28 = vsel %vm2273_vm7, %v581_v19, %v587_v10  ;;  %v560_v31 = vsel %vm2267_vm6, %v524_v20, %v559_v15  ;;  %v563_v32 = vsel %vm2273_vm7, %v525_v21, %v562_v16 }
  0xa2   : > { %586 = vst [vmem:[#allocation2] sm:$0xf] %v585_v27  ;;  %589 = vst [vmem:[#allocation2 + $0x4] sm:$0x1] %v588_v28  ;;  %v516_v33 = vor.u32 %v514_v23, %v513_v22  ;;  %v517_v34 = vrot.slane %v513_v22, 4  ;;  %v600_v35 = vshrl.u32 %v1888_v24, 16 }
  0xa3   : > { %561 = vst [vmem:[#allocation2 + $0x20] sm:$0xf] %v560_v31  ;;  %564 = vst [vmem:[#allocation2 + $0x24] sm:$0x1] %v563_v32  ;;  %v603_v36 = vshll.u32 %v1888_v24, 16 }
  0xa4   : > { %v554_v38 = vsel %vm2267_vm6, %v516_v33, %v553_v29  ;;  %v557_v39 = vsel %vm2273_vm7, %v517_v34, %v556_v30  ;;  %v602_v41 = vrot.slane %v600_v35, 7  ;;  %v1001_v51 = vld [vmem:[#allocation2 + $0x10] sm:$0xf]  ;;  %v2324_v3 = vld [vmem:[#allocation2 + $0x14] sm:$0x1] }
  0xa5   : > { %v2304_v42 = vld [vmem:[#allocation2 + $0x8] sm:$0xf]  ;;  %555 = vst [vmem:[#allocation2 + $0x18] sm:$0xf] %v554_v38  ;;  %558 = vst [vmem:[#allocation2 + $0x1c] sm:$0x1] %v557_v39 }
  0xa6   : > { %v2306_v44 = vld [vmem:[#allocation2 + $0xc] sm:$0x1]  ;;  %v643_v45 = vshrl.u32 %v2304_v42, 16  ;;  %v646_v46 = vshll.u32 %v2304_v42, 16  ;;  %v999_v47 = vld [vmem:[#allocation2 + $0x8] sm:$0xf]  ;;  %v605_v48 = vor.u32 %v603_v36, %v602_v41 }
  0xa7   : > { %v606_v50 = vrot.slane %v602_v41, 4  ;;  %v1008_v52 = vshrl.u32 %v999_v47, 16  ;;  %v1011_v55 = vshll.u32 %v999_v47, 16  ;;  %v652_v58 = vshll.u32 %v2306_v44, 16  ;;  %v2315_v59 = vld [vmem:[#allocation2 + $0xc] sm:$0x1] }
  0xa8   : > { %v645_v53 = vrot.slane %v643_v45, 4  ;;  %v648_v54 = vrot.slane %v646_v46, 5  ;;  %v611_v56 = vsel %vm2267_vm6, %v605_v48, %v610_v37  ;;  %v1022_v1 = vshrl.u32 %v1001_v51, 16  ;;  %v2327_v7 = vld [vmem:[#allocation2 + $0x10] sm:$0xf] }
  0xa9   : > { %v614_v57 = vsel %vm2273_vm7, %v606_v50, %v613_v40  ;;  %v1010_v60 = vrot.slane %v1008_v52, 4  ;;  %612 = vst [vmem:[#allocation2 + $0x28] sm:$0xf] %v611_v56  ;;  %v2317_v61 = vld [vmem:[#allocation2] sm:$0xf]  ;;  %v1013_v0 = vrot.slane %v1011_v55, 5 }
  0xaa   : > { %615 = vst [vmem:[#allocation2 + $0x2c] sm:$0x1] %v614_v57  ;;  %v2319_v62 = vld [vmem:[#allocation2 + $0x4] sm:$0x1]  ;;  %v649_v63 = vor.u32 %v648_v54, %v645_v53  ;;  %v629_v43 = vshrl.u32 %v2317_v61, 16  ;;  %v632_v2 = vshll.u32 %v2317_v61, 16 }
  0xab   : > { %v638_v49 = vshll.u32 %v2319_v62, 16  ;;  %v1014_v5 = vor.u32 %v1013_v0, %v1010_v60  ;;  %v1017_v6 = vshll.u32 %v2315_v59, 16  ;;  %v1024_v11 = vrot.slane %v1022_v1, 4  ;;  %v2341_v23 = vld [vmem:[#allocation2 + $0x14] sm:$0x1] }
  0xac   : > { %v650_v4 = vrot.slane %v649_v63, 4  ;;  %v631_v9 = vrot.slane %v629_v43, 4  ;;  %v634_v10 = vrot.slane %v632_v2, 5  ;;  %v1025_v12 = vshll.u32 %v1001_v51, 16  ;;  %v2336_v16 = vld [vmem:[#allocation2 + $0x18] sm:$0xf] }
  0xad   : > { %v654_v13 = vrot.slane %v652_v58, 5  ;;  %v1015_v14 = vrot.slane %v1014_v5, 4  ;;  %v1031_v15 = vshll.u32 %v2324_v3, 16  ;;  %v640_v18 = vrot.slane %v638_v49, 5  ;;  %v2344_v29 = vld [vmem:[#allocation2 + $0x1c] sm:$0x1] }
  0xae   : > { %v635_v17 = vor.u32 %v634_v10, %v631_v9  ;;  %v1027_v19 = vrot.slane %v1025_v12, 5  ;;  %v657_v20 = vshrl.u32 %v2327_v7, 16  ;;  %v1019_v22 = vrot.slane %v1017_v6, 5  ;;  %v1003_v36 = vld [vmem:[#allocation2 + $0x18] sm:$0xf] }
  0xaf   : > { %v655_v21 = vsel %vm2331_vm11, %v650_v4, %v654_v13  ;;  %v660_v24 = vshll.u32 %v2327_v7, 16  ;;  %v671_v31 = vshrl.u32 %v2336_v16, 16  ;;  %v1033_v33 = vrot.slane %v1031_v15, 5  ;;  %v2353_v41 = vld [vmem:[#allocation2 + $0x1c] sm:$0x1] }
  0xb0   : > { %v636_v27 = vrot.slane %v635_v17, 4  ;;  %v1028_v28 = vor.u32 %v1027_v19, %v1024_v11  ;;  %v659_v30 = vrot.slane %v657_v20, 4  ;;  %v1020_v32 = vsel %vm2331_vm11, %v1015_v14, %v1019_v22  ;;  %v1005_v50 = vld [vmem:[#allocation2 + $0x20] sm:$0xf]  ;;  %v2358_v52 = vld [vmem:[#allocation2 + $0x24] sm:$0x1] }
  0xb1   : > { %v662_v34 = vrot.slane %v660_v24, 5  ;;  %v674_v35 = vshll.u32 %v2336_v16, 16  ;;  %v666_v39 = vshll.u32 %v2341_v23, 16  ;;  %v673_v40 = vrot.slane %v671_v31, 4  ;;  %v1133_v6 = vld [vmem:[#allocation2 + $0x8] sm:$0xe] }
  0xb2   : > { %v641_v37 = vsel %vm2331_vm11, %v636_v27, %v640_v18  ;;  %v1029_v38 = vrot.slane %v1028_v28, 4  ;;  %v680_v48 = vshll.u32 %v2344_v29, 16  ;;  %v1036_v53 = vshrl.u32 %v1003_v36, 16  ;;  %v1134_v12 = vld [vmem:[#allocation2 + $0x10] sm:$0xe] }
  0xb3   : > { %v1818_v45 = vcombine.low %v641_v37, %v655_v21  ;;  %v663_v46 = vor.u32 %v662_v34, %v659_v30  ;;  %v676_v47 = vrot.slane %v674_v35, 5  ;;  %v1039_v54 = vshll.u32 %v1003_v36, 16  ;;  %v1830_v24 = vld [vmem:[%s2513_s3 + $0x4] sm:$0x3] }
  0xb4   : > { %v1034_v51 = vsel %vm2331_vm11, %v1029_v38, %v1033_v33  ;;  %v769_v55 = vsel %vm699_vm2, %v2255_v26, 0  ;;  %v1045_v60 = vshll.u32 %v2353_v41, 16  ;;  %v1038_v63 = vrot.slane %v1036_v53, 4 }
  0xb5   : > { %1918 = vmatprep.mubr.msk.bf16.mxu1 %vm692_vm12, %v1818_v45  ;;  %v1841_v56 = vcombine.low %v1020_v32, %v1034_v51  ;;  %v664_v57 = vrot.slane %v663_v46, 4  ;;  %v677_v58 = vor.u32 %v676_v47, %v673_v40  ;;  %v1041_v0 = vrot.slane %v1039_v54, 5  ;;  %v821_v32 = vld [vmem:[#allocation2 + $0x8] sm:$0xe]  ;;  %v1135_v46 = vld [vmem:[#allocation2 + $0x18] sm:$0xe] }
  0xb6   : > { %v1050_v1 = vshrl.u32 %v1005_v50, 16  ;;  %v1053_v43 = vshll.u32 %v1005_v50, 16  ;;  %v1147_v2 = vrot.slane %v2315_v59, 5  ;;  %v668_v49 = vrot.slane %v666_v39, 5  ;;  %v1854_v39 = vld [vmem:[%s2513_s3 + $0xc] sm:$0x3] }
  0xb7   : > { %1942 = vmatprep.mubr.msk.bf16.mxu0 %vm692_vm12, %v1841_v56  ;;  %v678_v4 = vrot.slane %v677_v58, 4  ;;  %v682_v5 = vrot.slane %v680_v48, 5  ;;  %v1042_v26 = vor.u32 %v1041_v0, %v1038_v63  ;;  %v1059_v11 = vshll.u32 %v2358_v52, 16  ;;  %v1136_v47 = vld [vmem:[#allocation2 + $0x20] sm:$0xe] }
  0xb8   : > { %v1052_v9 = vrot.slane %v1050_v1, 4  ;;  %v1055_v10 = vrot.slane %v1053_v43, 5  ;;  %v1151_v13 = vrot.slane %v2324_v3, 5  ;;  %v669_v14 = vsel %vm2331_vm11, %v664_v57, %v668_v49  ;;  %v1310_v54 = vld [vmem:[#allocation2 + $0x10] sm:$0xf] }
  0xb9   : > { %v683_v15 = vsel %vm2331_vm11, %v678_v4, %v682_v5  ;;  %v1047_v17 = vrot.slane %v1045_v60, 5  ;;  %v1043_v18 = vrot.slane %v1042_v26, 4  ;;  %v1845_v21 = vrot.slane %v1133_v6, 9  ;;  %v1835_v63 = vld [vmem:[%s2513_s3 + $0x6] sm:$0x3] }
  0xba   : > { %v1819_v59 = vcombine.low %v669_v14, %v683_v15  ;;  %v1056_v19 = vor.u32 %v1055_v10, %v1052_v9  ;;  %v1822_v3 = vcombine.low %v2317_v61, %v2304_v42  ;;  %v1846_v22 = vrot.slane %v1134_v12, 9  ;;  %v820_v61 = vld [vmem:[#allocation2] sm:$0xe]  ;;  %v823_v43 = vld [vmem:[#allocation2 + $0x18] sm:$0xe] }
  0xbb   : > { %v1048_v27 = vsel %vm2331_vm11, %v1043_v18, %v1047_v17  ;;  %v1061_v30 = vrot.slane %v1059_v11, 5  ;;  %v1148_v31 = vsel %vm2374_vm15, %v1845_v21, %v1147_v2  ;;  %v841_v34 = vrot.slane %v2306_v44, 5  ;;  %v1312_v44 = vld [vmem:[#allocation2 + $0x18] sm:$0xf]  ;;  %v822_v4 = vld [vmem:[#allocation2 + $0x10] sm:$0xe] }
  0xbc   : > { %1919 = vmatmul.mubr.msk.bf16.vlgmr.msra.gmra.mrb[0].mxu1 %vm692_vm12, %v1819_v59  ;;  %v1057_v28 = vrot.slane %v1056_v19, 4  ;;  %v1152_v42 = vsel %vm2374_vm15, %v1846_v22, %v1151_v13  ;;  %v1176_v36 = vsel %vm699_vm2, %v2248_v25, 0  ;;  %v837_v37 = vrot.slane %v2319_v62, 5  ;;  %v2065_v10 = vld [vmem:[#allocation2 + $0x10] ss:$8 sps:$4 sm:$0xff]  }
  0xbd   : > { %1924 = vmatprep.mubr.msk.bf16.mxu1 %vm692_vm12, %v1822_v3  ;;  %1923 = vmatpush3.bf16.msra.mxu1 %v769_v55  ;;  %v1850_v38 = vcombine.low %v1148_v31, %v1152_v42  ;;  %v1826_v40 = vrot.slane %v820_v61, 9  ;;  %v1827_v45 = vrot.slane %v821_v32, 9  ;;  %v1155_v48 = vrot.slane %v2353_v41, 5  ;;  %v1859_v11 = vld [vmem:[%s2513_s3 + $0xe] sm:$0x3] }
  0xbe   : > { %v1062_v33 = vsel %vm2331_vm11, %v1057_v28, %v1061_v30  ;;  %2004 = vmatprep.subr.msk.bf16.mxu1 %vm699_vm2, %v1830_v24  ;;  %v1159_v25 = vrot.slane %v2358_v52, 5  ;;  %v1847_v62 = vrot.slane %v1135_v46, 9  ;;  %v1848_v50 = vrot.slane %v1136_v47, 9  ;;  %v2428_v12 = vld [vmem:[#allocation2 + $0x1c] sm:$0x1] }
  0xbf   : > { %v1842_v35 = vcombine.low %v1048_v27, %v1062_v33  ;;  %v838_v51 = vsel %vm2374_vm15, %v1826_v40, %v837_v37  ;;  %v842_v53 = vsel %vm2374_vm15, %v1827_v45, %v841_v34  ;;  %v1333_v55 = vshrl.u32 %v1312_v44, 16  ;;  %v1314_v15 = vld [vmem:[#allocation2 + $0x20] sm:$0xf]  ;;  %v1316_v17 = vld [vmem:[#allocation2 + $0x28] sm:$0xf] }
  0xc0   : > { %v1336_v56 = vshll.u32 %v1312_v44, 16  ;;  %v1823_v57 = vcombine.low %v2327_v7, %v2336_v16  ;;  %v866_v41 = vsel %vm699_vm2, %v1830_v24, 0  ;;  %v1831_v58 = vcombine.low %v838_v51, %v842_v53  ;;  %v1311_v59 = vld [vmem:[#allocation2 + $0x14] sm:$0x1]  ;;  %v2067_v61 = vld [vmem:[#allocation2 + $0x8] ss:$8 sps:$4 sm:$0xff]  }
  0xc1   : > { %1943 = vmatmul.mubr.msk.bf16.vlgmr.msra.gmra.mrb[0].mxu0 %vm692_vm12, %v1842_v35  ;;  %v1319_v52 = vshrl.u32 %v1310_v54, 16  ;;  %v1322_v60 = vshll.u32 %v1310_v54, 16  ;;  %v1156_v0 = vsel %vm2374_vm15, %v1847_v62, %v1155_v48  ;;  %v1160_v1 = vsel %vm2374_vm15, %v1848_v50, %v1159_v25  ;;  %v2066_v45 = vld [vmem:[#allocation2 + $0x20] ss:$8 sps:$4 sm:$0xff]   ;;  %v1315_v47 = vld [vmem:[#allocation2 + $0x24] sm:$0x1] }
  0xc2   : > { %1947 = vmatpush3.bf16.msra.mxu0 %v1176_v36  ;;  %1948 = vmatprep.mubr.msk.bf16.mxu0 %vm692_vm12, %v1850_v38  ;;  %v1335_v7 = vrot.slane %v1333_v55, 4  ;;  %v1338_v16 = vrot.slane %v1336_v56, 5  ;;  %v849_v2 = vrot.slane %v2344_v29, 5  ;;  %v1255_v49 = vsel %vm699_vm2, %v1854_v39, 0  ;;  %v1317_v44 = vld [vmem:[#allocation2 + $0x2c] sm:$0x1] }
  0xc3   : > { %2008 = vmatprep.subr.msk.bf16.mxu0 %vm699_vm2, %v1854_v39  ;;  %v1851_v5 = vcombine.low %v1156_v0, %v1160_v1  ;;  %v1829_v6 = vrot.slane %v823_v43, 9  ;;  %v1321_v26 = vrot.slane %v1319_v52, 4  ;;  %v1324_v9 = vrot.slane %v1322_v60, 5  ;;  %v1868_v25 = vld [vmem:[%s2513_s3 + $0x10] sm:$0x3] }
  0xc4   : > { %v845_v13 = vrot.slane %v2341_v23, 5  ;;  %v1828_v29 = vrot.slane %v822_v4, 9  ;;  %v1339_v14 = vor.u32 %v1338_v16, %v1335_v7  ;;  %v1342_v21 = vshll.u32 %v2428_v12, 16  ;;  %v1445_v54 = vld [vmem:[#allocation2 + $0x18] sm:$0xe] }
  0xc5   : > { %v850_v18 = vsel %vm2374_vm15, %v1829_v6, %v849_v2  ;;  %v1325_v19 = vor.u32 %v1324_v9, %v1321_v26  ;;  %v1347_v3 = vshrl.u32 %v1314_v15, 16  ;;  %v1350_v23 = vshll.u32 %v1314_v15, 16  ;;  %v2068_v60 = vld [vmem:[#allocation2 + $0x18] ss:$8 sps:$4 sm:$0xff]   ;;  %v1447_v26 = vld [vmem:[#allocation2 + $0x28] sm:$0xe] }
  0xc6   : > { %v1361_v22 = vshrl.u32 %v1316_v17, 16  ;;  %v1364_v24 = vshll.u32 %v1316_v17, 16  ;;  %v846_v27 = vsel %vm2374_vm15, %v1828_v29, %v845_v13  ;;  %v1328_v28 = vshll.u32 %v1311_v59, 16  ;;  %v1446_v6 = vld [vmem:[#allocation2 + $0x20] sm:$0xe] }
  0xc7   : > { %v1340_v30 = vrot.slane %v1339_v14, 4  ;;  %v1832_v31 = vcombine.low %v846_v27, %v850_v18  ;;  %v944_v42 = vsel %vm699_vm2, %v1835_v63, 0  ;;  %v1326_v32 = vrot.slane %v1325_v19, 4 }
  0xc8   : > { %1925 = vmatmul.mubr.msk.bf16.vlgmr.msra.gmra.mrb[0].mxu1 %vm692_vm12, %v1823_v57  ;;  %v1344_v33 = vrot.slane %v1342_v21, 5  ;;  %v1349_v34 = vrot.slane %v1347_v3, 4  ;;  %v1352_v35 = vrot.slane %v1350_v23, 5  ;;  %v1363_v36 = vrot.slane %v1361_v22, 4 }
  0xc9   : > { %1930 = vmatprep.mubr.msk.bf16.mxu1 %vm692_vm12, %v1831_v58  ;;  %1929 = vmatpush3.bf16.msra.mxu1 %v866_v41  ;;  %v1366_v37 = vrot.slane %v1364_v24, 5  ;;  %v1330_v38 = vrot.slane %v1328_v28, 5  ;;  %v1389_v40 = vsel %vm699_vm2, %v1859_v11, 0  ;;  %v1370_v51 = vshll.u32 %v1317_v44, 16  ;;  %v1444_v41 = vld [vmem:[#allocation2 + $0x10] sm:$0xe] }
  0xca   : > { %2005 = vmatprep.subr.msk.bf16.mxu1 %vm699_vm2, %v1835_v63  ;;  %v1345_v39 = vsel %vm2331_vm11, %v1340_v30, %v1344_v33  ;;  %v1353_v62 = vor.u32 %v1352_v35, %v1349_v34  ;;  %v1356_v53 = vshll.u32 %v1315_v47, 16  ;;  %v1865_v58 = vrot.slane %v1445_v54, 9 }
  0xcb   : > { %v1331_v46 = vsel %vm2331_vm11, %v1326_v32, %v1330_v38  ;;  %v1367_v50 = vor.u32 %v1366_v37, %v1363_v36  ;;  %v1372_v57 = vrot.slane %v1370_v51, 5  ;;  %v1462_v52 = vrot.slane %v2428_v12, 5 }
  0xcc   : > { %v1860_v48 = vcombine.low %v1331_v46, %v1345_v39  ;;  %v1354_v55 = vrot.slane %v1353_v62, 4  ;;  %v1358_v63 = vrot.slane %v1356_v53, 5  ;;  %v1864_v0 = vrot.slane %v1444_v41, 9 }
  0xcd   : > { %1949 = vmatmul.mubr.msk.bf16.vlgmr.msra.gmra.mrb[0].mxu0 %vm692_vm12, %v1851_v5  ;;  %v1368_v56 = vrot.slane %v1367_v50, 4  ;;  %v1458_v1 = vrot.slane %v1311_v59, 5  ;;  %v1463_v16 = vsel %vm2374_vm15, %v1865_v58, %v1462_v52  ;;  %v1866_v8 = vrot.slane %v1446_v6, 9 }
  0xce   : > { %1953 = vmatpush3.bf16.msra.mxu0 %v1255_v49  ;;  %1954 = vmatprep.mubr.msk.bf16.mxu0 %vm692_vm12, %v2065_v10  ;;  %v1359_v43 = vsel %vm2331_vm11, %v1354_v55, %v1358_v63  ;;  %v1487_v49 = vsel %vm699_vm2, %v1868_v25, 0  ;;  %v1466_v9 = vrot.slane %v1315_v47, 5  ;;  %v1867_v10 = vrot.slane %v1447_v26, 9 }
  0xcf   : > { %2009 = vmatprep.subr.msk.bf16.mxu0 %vm699_vm2, %v1859_v11  ;;  %v1373_v7 = vsel %vm2331_vm11, %v1368_v56, %v1372_v57  ;;  %v1459_v4 = vsel %vm2374_vm15, %v1864_v0, %v1458_v1  ;;  %v1470_v11 = vrot.slane %v1317_v44, 5 }
  0xd0   : > { %v1861_v2 = vcombine.low %v1359_v43, %v1373_v7  ;;  %v1869_v5 = vcombine.low %v1459_v4, %v1463_v16  ;;  %v1467_v12 = vsel %vm2374_vm15, %v1866_v8, %v1466_v9 }
  0xd1   : > { %v1471_v13 = vsel %vm2374_vm15, %v1867_v10, %v1470_v11 }
  0xd2   : > { %v1870_v29 = vcombine.low %v1467_v12, %v1471_v13 }
  0xd4   : > { %1931 = vmatmul.mubr.msk.bf16.vlgmr.msra.gmra.mrb[0].mxu1 %vm692_vm12, %v1832_v31 }
  0xd5   : > { %1936 = vmatprep.mubr.msk.bf16.mxu1 %vm692_vm12, %v2067_v61  ;;  %1935 = vmatpush3.bf16.msra.mxu1 %v944_v42 }
  0xd9   : > { %1955 = vmatmul.mubr.msk.bf16.vlgmr.msra.gmra.mrb[0].mxu0 %vm692_vm12, %v2066_v45 }
  0xda   : > { %1959 = vmatpush3.bf16.msra.mxu0 %v1389_v40  ;;  %1960 = vmatprep.mubr.msk.bf16.mxu0 %vm692_vm12, %v1860_v48 }
  0xdb   : > { %2010 = vmatprep.subr.msk.bf16.mxu0 %vm699_vm2, %v1868_v25  ;;  %vm1582_vm2 = vcmask 1040384  }
  0xe0   : > { %1937 = vmatmul.mubr.msk.bf16.vlgmr.msra.gmra.mrb[0].mxu1 %vm692_vm12, %v2068_v60 }
  0xe5   : > { %1961 = vmatmul.mubr.msk.bf16.vlgmr.msra.gmra.mrb[0].mxu0 %vm692_vm12, %v1861_v2 }
  0xe6   : > { %1965 = vmatpush3.bf16.msra.mxu0 %v1487_v49  ;;  %1966 = vmatprep.mubr.msk.bf16.mxu0 %vm692_vm12, %v1869_v5 }
  0xf1   : > { %1967 = vmatmul.mubr.msk.bf16.vlgmr.msra.gmra.mrb[0].mxu0 %vm692_vm12, %v1870_v29 }
 0x1b3   : > { %v1938_v14 = vpop.f32.mrb[0].mxu1 }
 0x1b4   : > { %v980_v15 = vpop.f32.mrb[1].mxu1 }
 0x1b5   : > { %v1939_v17 = vpop.f32.mrb[2].mxu1 }
 0x1b6   : > { %v983_v59 = vpop.f32.mrb[3].mxu1 }
 0x1c4   : > { %v1968_v18 = vpop.f32.mrb[0].mxu0 }
 0x1c5   : > { %v1970_v19 = vadd.f32 %v1968_v18, %v1938_v14  ;;  %v1523_v21 = vpop.f32.mrb[1].mxu0 }
 0x1c6   : > { %v1971_v20 = vadd.f32 %v1523_v21, %v980_v15  ;;  %v1969_v3 = vpop.f32.mrb[2].mxu0 }
 0x1c7   : > { %v1544_v23 = vpack.c.bf16 %v1970_v19, %v1970_v19  ;;  %v1972_v22 = vadd.f32 %v1969_v3, %v1939_v17  ;;  %v1526_v24 = vpop.f32.mrb[3].mxu0  ;;  %v1567_v31 = vmul.f32 %v1970_v19, %v1970_v19  ;;  %v1555_v36 = vsel %vm1551_vm1, %v1970_v19, 0.0 }
 0x1c8   : > { %v1542_v27 = vpack.c.bf16 %v1971_v20, %v1971_v20  ;;  %v1565_v28 = vmul.f32 %v1971_v20, %v1971_v20  ;;  %v1973_v30 = vadd.f32 %v1526_v24, %v983_v59  ;;  %v1552_v61 = vsel %vm1551_vm1, %v1971_v20, 0.0 }
 0x1c9   : > { %1549 = vst.msk [vmem:[%s402_s17 + $0x8] sm:$0xf] %vm1546_vm0, %v1544_v23  ;;  %v1545_v42 = vpack.c.bf16 %v1972_v22, %v1972_v22  ;;  %v1568_v38 = vmul.f32 %v1972_v22, %v1972_v22  ;;  %v1572_v46 = vsel %vm1551_vm1, %v1567_v31, 0.0  ;;  %v1557_v47 = vsel %vm1551_vm1, %v1972_v22, 0.0 }
 0x1ca   : > { %1547 = vst.msk [vmem:[%s402_s17] sm:$0xf] %vm1546_vm0, %v1542_v27  ;;  %v1543_v32 = vpack.c.bf16 %v1973_v30, %v1973_v30  ;;  %v1553_v33 = vsel %vm1551_vm1, %v1973_v30, 0.0  ;;  %v1566_v34 = vmul.f32 %v1973_v30, %v1973_v30  ;;  %v1569_v37 = vsel %vm1551_vm1, %v1565_v28, 0.0 }
 0x1cb   : > { %1550 = vst.msk [vmem:[%s402_s17 + $0xc] sm:$0xf] %vm1546_vm0, %v1545_v42  ;;  %v1554_v35 = vadd.f32 %v1553_v33, %v1552_v61  ;;  %v1574_v25 = vsel %vm1551_vm1, %v1568_v38, 0.0 }
 0x1cc   : > { %1548 = vst.msk [vmem:[%s402_s17 + $0x4] sm:$0xf] %vm1546_vm0, %v1543_v32  ;;  %v1570_v39 = vsel %vm1551_vm1, %v1566_v34, 0.0 }
 0x1cd   : > { %v1556_v40 = vadd.f32 %v1555_v36, %v1554_v35  ;;  %v1571_v45 = vadd.f32 %v1570_v39, %v1569_v37 }
 0x1cf   : > { %v1558_v44 = vadd.f32 %v1557_v47, %v1556_v40  ;;  %v1573_v48 = vadd.f32 %v1572_v46, %v1571_v45 }
 0x1d1   : > { %v1559_v62 = vrot.slane %v1558_v44, 4  ;;  %v1575_v50 = vadd.f32 %v1574_v25, %v1573_v48 }
 0x1d3   : > { %v1560_v51 = vadd.f32 %v1559_v62, %v1558_v44  ;;  %v1576_v53 = vrot.slane %v1575_v50, 4 }
 0x1d5   : > { %v1561_v54 = vrot.slane %v1560_v51, 2  ;;  %v1577_v55 = vadd.f32 %v1576_v53, %v1575_v50 }
 0x1d7   : > { %v1562_v56 = vadd.f32 %v1561_v54, %v1560_v51  ;;  %v1578_v57 = vrot.slane %v1577_v55, 2 }
 0x1d9   : > { %v1563_v41 = vrot.slane %v1562_v56, 1  ;;  %v1579_v58 = vadd.f32 %v1578_v57, %v1577_v55 }
 0x1db   : > { %v1580_v52 = vrot.slane %v1579_v58, 1  ;;  %v1564_v60 = vadd.f32 %v1563_v41, %v1562_v56 }
 0x1dd   : > { %v1581_v63 = vadd.f32 %v1580_v52, %v1579_v58 }
 0x1df   : > { %v1583_v0 = vsel %vm1582_vm2, %v1564_v60, %v1581_v63 }
 0x1e0   : > { %1585 = vst.msk [vmem:[%s411_s6] sm:$0x3] %vm1584_vm3, %v1583_v0 }
 0x1e1 PF: > { %s16_s22 = sadd.s32 1, %s2107_s22   ;;  %s2527_s18 = smov %s2099_s20 }
 0x1e2   : > { %p13_p12 = scmp.ge.s32.totalorder %s16_s22, 6   ;;  %s2528_s19 = smov %s2103_s21 }
 0x1e3   : > { %s2529_s20 = smov %s2532_s23  ;;  %s2530_s21 = smov %s2536_s24 }
 0x1e4   :  { %15 = sbr.rel (!%p13_p12) target bundleno = 3 (0x3), region = 98 }

</bundles_post_ra>
